<compile_context>
chip_gen: v7x
topology: tpu7x:2x2x1
jax: 0.10.0
libtpu: 0.0.40
codegen_flags: <defaults>
</compile_context>

<pallas_src>
import functools

import jax
import jax.numpy as jnp
from jax.experimental import pallas as pl
from jax.experimental.pallas import tpu as pltpu


def _round_up(x, m):
    return (x + m - 1) // m * m


def _sigmoid(z):
    # 1 / (1 + exp(-z)); exp and the approx reciprocal both go to the EUP slot.
    return pl.reciprocal(1.0 + jnp.exp(-z), approx=True)


def lstm_recurrence_kernel(gx_ref, whh_ref, h_out_ref, h_scr, c_scr):
    """One grid step = T_CHUNK LSTM time steps.

    gx_ref   : [T_CHUNK, B_pad, 4*H_pad] bf16  pre-projected input gates
               (x_t @ W_ih^T + b_ih + b_hh), gate-blocked [i|f|g|o].
    whh_ref  : [H_pad, 4*H_pad]          bf16  recurrent weights (resident).
    h_out_ref: [T_CHUNK, B_pad, H_pad]   f32   hidden state per time step.
    h_scr/c_scr: [B_pad, H_pad]          f32   LSTM state, persists across grid.
    """
    # init_hidden: zero state before the very first chunk.
    @pl.when(pl.program_id(0) == 0)
    def _():
        h_scr[...] = jnp.zeros_like(h_scr)
        c_scr[...] = jnp.zeros_like(c_scr)

    hp = h_scr.shape[-1]            # padded hidden width (lane multiple)
    w_hh = whh_ref[...]             # loop-invariant bf16 weight tile

    def step(s, carry):
        gx = gx_ref[s].astype(jnp.float32)          # [B_pad, 4*H_pad]
        h_prev = h_scr[...]
        c_prev = c_scr[...]

        # Only the recurrent matmul is on the serial critical path
        # (bf16 MXU operands, f32 accumulation).
        gates = gx + jnp.dot(h_prev.astype(jnp.bfloat16), w_hh,
                             preferred_element_type=jnp.float32)

        # lane-aligned [B, H] gate slices (PyTorch gate order i, f, g, o)
        i_g = _sigmoid(gates[:, 0 * hp:1 * hp])
        f_g = _sigmoid(gates[:, 1 * hp:2 * hp])
        g_g = jnp.tanh(gates[:, 2 * hp:3 * hp])
        o_g = _sigmoid(gates[:, 3 * hp:4 * hp])

        c_new = f_g * c_prev + i_g * g_g
        h_new = o_g * jnp.tanh(c_new)

        c_scr[...] = c_new
        h_scr[...] = h_new
        h_out_ref[s] = h_new
        return carry

    jax.lax.fori_loop(0, gx_ref.shape[0], step, 0, unroll=True)


@functools.partial(jax.jit, static_argnames=("t_chunk",))
def lstm_forward(x, params, t_chunk=8):
    """x: [B, T, in_dim] -> [B, T, out_dim], matching Lstm.forward."""
    w_ih, w_hh, b_ih, b_hh, w_lin, b_lin = params
    B, T, _ = x.shape
    H = w_hh.shape[1]

    B_pad = _round_up(B, 8)
    H_pad = _round_up(H, 128)
    T_pad = _round_up(T, t_chunk)

    # ---- phase 1 (XLA): input projection hoisted out of the recurrence ----
    # one big [T*B, in] x [in, 4H] matmul instead of T tiny M=B_pad matmuls.
    x_tm = jnp.transpose(x, (1, 0, 2))                              # [T, B, in]
    gx = jnp.einsum('tbi,gi->tbg', x_tm, w_ih) + (b_ih + b_hh)      # [T, B, 4H]
    gx = gx.reshape(T, B, 4, H)
    gx = jnp.pad(gx, ((0, T_pad - T), (0, B_pad - B), (0, 0), (0, H_pad - H)))
    gx = gx.reshape(T_pad, B_pad, 4 * H_pad).astype(jnp.bfloat16)

    # recurrent weights: gate-blocked [i|f|g|o], pre-transposed for h @ W, bf16.
    w4 = jnp.pad(w_hh.reshape(4, H, H),
                 ((0, 0), (0, H_pad - H), (0, H_pad - H)))          # [4,Hp,Hp]
    whh_p = jnp.transpose(w4, (2, 0, 1)).reshape(
        H_pad, 4 * H_pad).astype(jnp.bfloat16)                      # [Hp, 4*Hp]

    # ---- phase 2 (Pallas): the serial LSTM recurrence ----
    h_seq = pl.pallas_call(
        lstm_recurrence_kernel,
        out_shape=jax.ShapeDtypeStruct((T_pad, B_pad, H_pad), jnp.float32),
        grid=(T_pad // t_chunk,),
        in_specs=[
            pl.BlockSpec((t_chunk, B_pad, 4 * H_pad), lambda t: (t, 0, 0)),
            pl.BlockSpec((H_pad, 4 * H_pad), lambda t: (0, 0),
                         pipeline_mode=pl.Buffered(1)),   # constant weight: single-buffer
        ],
        out_specs=pl.BlockSpec((t_chunk, B_pad, H_pad), lambda t: (t, 0, 0)),
        scratch_shapes=[pltpu.VMEM((B_pad, H_pad), jnp.float32),    # h state
                        pltpu.VMEM((B_pad, H_pad), jnp.float32)],   # c state
        compiler_params=pltpu.CompilerParams(
            dimension_semantics=("arbitrary",)),          # recurrence over time
    )(gx, whh_p)

    # ---- phase 3 (XLA): output Linear hoisted out of the recurrence ----
    h_seq = h_seq[:T, :B, :H]                                       # [T, B, H]
    y = jnp.einsum('tbh,oh->tbo', h_seq, w_lin) + b_lin             # [T, B, out]
    return jnp.transpose(y, (1, 0, 2))                              # [B, T, out]


def init_params(key, in_dim, hidden_dim, out_dim):
    """Synthetic parameters with PyTorch nn.LSTM / nn.Linear layouts."""
    ks = jax.random.split(key, 6)
    s = 1.0 / jnp.sqrt(jnp.float32(hidden_dim))
    w_ih = jax.random.uniform(ks[0], (4 * hidden_dim, in_dim), jnp.float32, -s, s)
    w_hh = jax.random.uniform(ks[1], (4 * hidden_dim, hidden_dim), jnp.float32, -s, s)
    b_ih = jax.random.uniform(ks[2], (4 * hidden_dim,), jnp.float32, -s, s)
    b_hh = jax.random.uniform(ks[3], (4 * hidden_dim,), jnp.float32, -s, s)
    w_lin = jax.random.uniform(ks[4], (out_dim, hidden_dim), jnp.float32, -s, s)
    b_lin = jax.random.uniform(ks[5], (out_dim,), jnp.float32, -s, s)
    return (w_ih, w_hh, b_ih, b_hh, w_lin, b_lin)


def reference_forward(x, params):
    """Pure-JAX f32 LSTM + Linear reference (PyTorch gate order i, f, g, o)."""
    w_ih, w_hh, b_ih, b_hh, w_lin, b_lin = params
    B, _, _ = x.shape
    H = w_hh.shape[1]

    def step(carry, x_t):
        h, c = carry
        gates = x_t @ w_ih.T + b_ih + h @ w_hh.T + b_hh
        i, f, g, o = jnp.split(gates, 4, axis=-1)
        i = jax.nn.sigmoid(i)
        f = jax.nn.sigmoid(f)
        g = jnp.tanh(g)
        o = jax.nn.sigmoid(o)
        c = f * c + i * g
        h = o * jnp.tanh(c)
        return (h, c), h

    h0 = jnp.zeros((B, H), jnp.float32)
    c0 = jnp.zeros((B, H), jnp.float32)
    _, hs = jax.lax.scan(step, (h0, c0), jnp.transpose(x, (1, 0, 2)))
    hs = jnp.transpose(hs, (1, 0, 2))                               # [B, T, H]
    return hs @ w_lin.T + b_lin


if __name__ == "__main__":
    # Small shapes consistent with the module: batch=4, seq=16, in_dim=3,
    # hidden_dim=32, out_dim=1 (two time chunks exercise state carry-over).
    B, T, IN, HID, OUT = 4, 16, 3, 32, 1
    key = jax.random.PRNGKey(0)
    kx, kp = jax.random.split(key)
    x = jax.random.normal(kx, (B, T, IN), jnp.float32)
    params = init_params(kp, IN, HID, OUT)

    out = lstm_forward(x, params)
    out = jax.block_until_ready(out)

    ref = reference_forward(x, params)
    assert out.shape == (B, T, OUT)
    # bf16 MXU operands + approx reciprocal vs. full-f32 reference.
    assert jnp.allclose(out, ref, atol=2e-2, rtol=2e-2), "mismatch vs reference"
    print("KERNEL_OK")
</pallas_src>

<mosaic_0001>
module attributes {stable_mosaic.version = 11 : i64} {
  func.func @lstm_recurrence_kernel(%arg0: i32, %arg1: memref<8x8x512xbf16, #tpu.memory_space<vmem>>, %arg2: memref<128x512xbf16, #tpu.memory_space<vmem>>, %arg3: memref<8x8x128xf32, #tpu.memory_space<vmem>>, %arg4: memref<8x128xf32, #tpu.memory_space<vmem>>, %arg5: memref<8x128xf32, #tpu.memory_space<vmem>>) attributes {dimension_semantics = [#tpu.dimension_semantics<arbitrary>], iteration_bounds = array<i64: 2>, scalar_prefetch = 0 : i64, scratch_operands = 2 : i64, tpu.core_type = #tpu.core_type<tc>, window_params = [{transform_indices = @transform_0, window_bounds = array<i64: 8, 8, 512>}, {pipeline_mode = #tpu.pipeline_mode<synchronous>, transform_indices = @transform_1, window_bounds = array<i64: 128, 512>}, {transform_indices = @transform_2, window_bounds = array<i64: 8, 8, 128>}]} {
    %c0_i32 = arith.constant 0 : i32
    %0 = arith.cmpi eq, %arg0, %c0_i32 : i32
    %1 = arith.extui %0 : i1 to i32
    %c0_i32_0 = arith.constant 0 : i32
    %2 = arith.cmpi ne, %1, %c0_i32_0 : i32
    scf.if %2 {
      %cst_154 = arith.constant 0.000000e+00 : f32
      %348 = vector.broadcast %cst_154 : f32 to vector<8x128xf32>
      %c0_155 = arith.constant 0 : index
      %c0_156 = arith.constant 0 : index
      %349 = vector.load %arg4[%c0_155, %c0_156] : memref<8x128xf32, #tpu.memory_space<vmem>>, vector<8x128xf32>
      tpu.vector_store %arg4[%c0_155, %c0_156], %348 {strides = array<i32>} : memref<8x128xf32, #tpu.memory_space<vmem>>, vector<8x128xf32>,
      %cst_157 = arith.constant 0.000000e+00 : f32
      %350 = vector.broadcast %cst_157 : f32 to vector<8x128xf32>
      %c0_158 = arith.constant 0 : index
      %c0_159 = arith.constant 0 : index
      %351 = vector.load %arg5[%c0_158, %c0_159] : memref<8x128xf32, #tpu.memory_space<vmem>>, vector<8x128xf32>
      tpu.vector_store %arg5[%c0_158, %c0_159], %350 {strides = array<i32>} : memref<8x128xf32, #tpu.memory_space<vmem>>, vector<8x128xf32>,
    } else {
    }
    %c0 = arith.constant 0 : index
    %c0_1 = arith.constant 0 : index
    %3 = vector.load %arg2[%c0, %c0_1] : memref<128x512xbf16, #tpu.memory_space<vmem>>, vector<128x512xbf16>
    %c0_i32_2 = arith.constant 0 : i32
    %4 = arith.index_cast %c0_i32_2 : i32 to index
    %c0_3 = arith.constant 0 : index
    %c0_4 = arith.constant 0 : index
    %5 = vector.load %arg1[%4, %c0_3, %c0_4] : memref<8x8x512xbf16, #tpu.memory_space<vmem>>, vector<1x8x512xbf16>
    %6 = vector.shape_cast %5 : vector<1x8x512xbf16> to vector<8x512xbf16>
    %7 = arith.extf %6 : vector<8x512xbf16> to vector<8x512xf32>
    %c0_5 = arith.constant 0 : index
    %c0_6 = arith.constant 0 : index
    %8 = vector.load %arg4[%c0_5, %c0_6] : memref<8x128xf32, #tpu.memory_space<vmem>>, vector<8x128xf32>
    %c0_7 = arith.constant 0 : index
    %c0_8 = arith.constant 0 : index
    %9 = vector.load %arg5[%c0_7, %c0_8] : memref<8x128xf32, #tpu.memory_space<vmem>>, vector<8x128xf32>
    %10 = arith.truncf %8 : vector<8x128xf32> to vector<8x128xbf16>
    %cst = arith.constant dense<0.000000e+00> : vector<8x512xf32>
    %11 = tpu.matmul %10, %3, %cst {dimension_numbers = #tpu.dot_dimension_numbers<[1], [0], [0], [1], [0, 0, 1, 1], [], []>} : vector<8x128xbf16>, vector<128x512xbf16>, vector<8x512xf32> -> vector<8x512xf32>
    %12 = arith.addf %7, %11 : vector<8x512xf32>
    %13 = vector.extract_strided_slice %12 {offsets = [0, 0], sizes = [8, 128], strides = [1, 1]} : vector<8x512xf32> to vector<8x128xf32>
    %cst_9 = arith.constant 0.000000e+00 : f32
    %14 = vector.broadcast %cst_9 : f32 to vector<8x128xf32>
    %15 = arith.subf %14, %13 : vector<8x128xf32>
    %16 = math.exp %15 : vector<8x128xf32>
    %cst_10 = arith.constant 1.000000e+00 : f32
    %17 = vector.broadcast %cst_10 : f32 to vector<8x128xf32>
    %18 = arith.addf %17, %16 : vector<8x128xf32>
    %19 = tpu.reciprocal %18 {approx = true} : vector<8x128xf32> -> vector<8x128xf32>
    %20 = vector.extract_strided_slice %12 {offsets = [0, 128], sizes = [8, 128], strides = [1, 1]} : vector<8x512xf32> to vector<8x128xf32>
    %cst_11 = arith.constant 0.000000e+00 : f32
    %21 = vector.broadcast %cst_11 : f32 to vector<8x128xf32>
    %22 = arith.subf %21, %20 : vector<8x128xf32>
    %23 = math.exp %22 : vector<8x128xf32>
    %cst_12 = arith.constant 1.000000e+00 : f32
    %24 = vector.broadcast %cst_12 : f32 to vector<8x128xf32>
    %25 = arith.addf %24, %23 : vector<8x128xf32>
    %26 = tpu.reciprocal %25 {approx = true} : vector<8x128xf32> -> vector<8x128xf32>
    %27 = vector.extract_strided_slice %12 {offsets = [0, 256], sizes = [8, 128], strides = [1, 1]} : vector<8x512xf32> to vector<8x128xf32>
    %28 = math.tanh %27 : vector<8x128xf32>
    %29 = vector.extract_strided_slice %12 {offsets = [0, 384], sizes = [8, 128], strides = [1, 1]} : vector<8x512xf32> to vector<8x128xf32>
    %cst_13 = arith.constant 0.000000e+00 : f32
    %30 = vector.broadcast %cst_13 : f32 to vector<8x128xf32>
    %31 = arith.subf %30, %29 : vector<8x128xf32>
    %32 = math.exp %31 : vector<8x128xf32>
    %cst_14 = arith.constant 1.000000e+00 : f32
    %33 = vector.broadcast %cst_14 : f32 to vector<8x128xf32>
    %34 = arith.addf %33, %32 : vector<8x128xf32>
    %35 = tpu.reciprocal %34 {approx = true} : vector<8x128xf32> -> vector<8x128xf32>
    %36 = arith.mulf %26, %9 : vector<8x128xf32>
    %37 = arith.mulf %19, %28 : vector<8x128xf32>
    %38 = arith.addf %36, %37 : vector<8x128xf32>
    %39 = math.tanh %38 : vector<8x128xf32>
    %40 = arith.mulf %35, %39 : vector<8x128xf32>
    %c0_15 = arith.constant 0 : index
    %c0_16 = arith.constant 0 : index
    %41 = vector.load %arg5[%c0_15, %c0_16] : memref<8x128xf32, #tpu.memory_space<vmem>>, vector<8x128xf32>
    tpu.vector_store %arg5[%c0_15, %c0_16], %38 {strides = array<i32>} : memref<8x128xf32, #tpu.memory_space<vmem>>, vector<8x128xf32>,
    %c0_17 = arith.constant 0 : index
    %c0_18 = arith.constant 0 : index
    %42 = vector.load %arg4[%c0_17, %c0_18] : memref<8x128xf32, #tpu.memory_space<vmem>>, vector<8x128xf32>
    tpu.vector_store %arg4[%c0_17, %c0_18], %40 {strides = array<i32>} : memref<8x128xf32, #tpu.memory_space<vmem>>, vector<8x128xf32>,
    %43 = arith.index_cast %c0_i32_2 : i32 to index
    %c0_19 = arith.constant 0 : index
    %c0_20 = arith.constant 0 : index
    %44 = vector.load %arg3[%43, %c0_19, %c0_20] : memref<8x8x128xf32, #tpu.memory_space<vmem>>, vector<1x8x128xf32>
    %45 = vector.shape_cast %44 : vector<1x8x128xf32> to vector<8x128xf32>
    %46 = vector.shape_cast %40 : vector<8x128xf32> to vector<1x8x128xf32>
    tpu.vector_store %arg3[%43, %c0_19, %c0_20], %46 {strides = array<i32>} : memref<8x8x128xf32, #tpu.memory_space<vmem>>, vector<1x8x128xf32>,
    %c1_i32 = arith.constant 1 : i32
    %47 = arith.index_cast %c1_i32 : i32 to index
    %c0_21 = arith.constant 0 : index
    %c0_22 = arith.constant 0 : index
    %48 = vector.load %arg1[%47, %c0_21, %c0_22] : memref<8x8x512xbf16, #tpu.memory_space<vmem>>, vector<1x8x512xbf16>
    %49 = vector.shape_cast %48 : vector<1x8x512xbf16> to vector<8x512xbf16>
    %50 = arith.extf %49 : vector<8x512xbf16> to vector<8x512xf32>
    %c0_23 = arith.constant 0 : index
    %c0_24 = arith.constant 0 : index
    %51 = vector.load %arg4[%c0_23, %c0_24] : memref<8x128xf32, #tpu.memory_space<vmem>>, vector<8x128xf32>
    %c0_25 = arith.constant 0 : index
    %c0_26 = arith.constant 0 : index
    %52 = vector.load %arg5[%c0_25, %c0_26] : memref<8x128xf32, #tpu.memory_space<vmem>>, vector<8x128xf32>
    %53 = arith.truncf %51 : vector<8x128xf32> to vector<8x128xbf16>
    %cst_27 = arith.constant dense<0.000000e+00> : vector<8x512xf32>
    %54 = tpu.matmul %53, %3, %cst_27 {dimension_numbers = #tpu.dot_dimension_numbers<[1], [0], [0], [1], [0, 0, 1, 1], [], []>} : vector<8x128xbf16>, vector<128x512xbf16>, vector<8x512xf32> -> vector<8x512xf32>
    %55 = arith.addf %50, %54 : vector<8x512xf32>
    %56 = vector.extract_strided_slice %55 {offsets = [0, 0], sizes = [8, 128], strides = [1, 1]} : vector<8x512xf32> to vector<8x128xf32>
    %cst_28 = arith.constant 0.000000e+00 : f32
    %57 = vector.broadcast %cst_28 : f32 to vector<8x128xf32>
    %58 = arith.subf %57, %56 : vector<8x128xf32>
    %59 = math.exp %58 : vector<8x128xf32>
    %cst_29 = arith.constant 1.000000e+00 : f32
    %60 = vector.broadcast %cst_29 : f32 to vector<8x128xf32>
    %61 = arith.addf %60, %59 : vector<8x128xf32>
    %62 = tpu.reciprocal %61 {approx = true} : vector<8x128xf32> -> vector<8x128xf32>
    %63 = vector.extract_strided_slice %55 {offsets = [0, 128], sizes = [8, 128], strides = [1, 1]} : vector<8x512xf32> to vector<8x128xf32>
    %cst_30 = arith.constant 0.000000e+00 : f32
    %64 = vector.broadcast %cst_30 : f32 to vector<8x128xf32>
    %65 = arith.subf %64, %63 : vector<8x128xf32>
    %66 = math.exp %65 : vector<8x128xf32>
    %cst_31 = arith.constant 1.000000e+00 : f32
    %67 = vector.broadcast %cst_31 : f32 to vector<8x128xf32>
    %68 = arith.addf %67, %66 : vector<8x128xf32>
    %69 = tpu.reciprocal %68 {approx = true} : vector<8x128xf32> -> vector<8x128xf32>
    %70 = vector.extract_strided_slice %55 {offsets = [0, 256], sizes = [8, 128], strides = [1, 1]} : vector<8x512xf32> to vector<8x128xf32>
    %71 = math.tanh %70 : vector<8x128xf32>
    %72 = vector.extract_strided_slice %55 {offsets = [0, 384], sizes = [8, 128], strides = [1, 1]} : vector<8x512xf32> to vector<8x128xf32>
    %cst_32 = arith.constant 0.000000e+00 : f32
    %73 = vector.broadcast %cst_32 : f32 to vector<8x128xf32>
    %74 = arith.subf %73, %72 : vector<8x128xf32>
    %75 = math.exp %74 : vector<8x128xf32>
    %cst_33 = arith.constant 1.000000e+00 : f32
    %76 = vector.broadcast %cst_33 : f32 to vector<8x128xf32>
    %77 = arith.addf %76, %75 : vector<8x128xf32>
    %78 = tpu.reciprocal %77 {approx = true} : vector<8x128xf32> -> vector<8x128xf32>
    %79 = arith.mulf %69, %52 : vector<8x128xf32>
    %80 = arith.mulf %62, %71 : vector<8x128xf32>
    %81 = arith.addf %79, %80 : vector<8x128xf32>
    %82 = math.tanh %81 : vector<8x128xf32>
    %83 = arith.mulf %78, %82 : vector<8x128xf32>
    %c0_34 = arith.constant 0 : index
    %c0_35 = arith.constant 0 : index
    %84 = vector.load %arg5[%c0_34, %c0_35] : memref<8x128xf32, #tpu.memory_space<vmem>>, vector<8x128xf32>
    tpu.vector_store %arg5[%c0_34, %c0_35], %81 {strides = array<i32>} : memref<8x128xf32, #tpu.memory_space<vmem>>, vector<8x128xf32>,
    %c0_36 = arith.constant 0 : index
    %c0_37 = arith.constant 0 : index
    %85 = vector.load %arg4[%c0_36, %c0_37] : memref<8x128xf32, #tpu.memory_space<vmem>>, vector<8x128xf32>
    tpu.vector_store %arg4[%c0_36, %c0_37], %83 {strides = array<i32>} : memref<8x128xf32, #tpu.memory_space<vmem>>, vector<8x128xf32>,
    %86 = arith.index_cast %c1_i32 : i32 to index
    %c0_38 = arith.constant 0 : index
    %c0_39 = arith.constant 0 : index
    %87 = vector.load %arg3[%86, %c0_38, %c0_39] : memref<8x8x128xf32, #tpu.memory_space<vmem>>, vector<1x8x128xf32>
    %88 = vector.shape_cast %87 : vector<1x8x128xf32> to vector<8x128xf32>
    %89 = vector.shape_cast %83 : vector<8x128xf32> to vector<1x8x128xf32>
    tpu.vector_store %arg3[%86, %c0_38, %c0_39], %89 {strides = array<i32>} : memref<8x8x128xf32, #tpu.memory_space<vmem>>, vector<1x8x128xf32>,
    %c2_i32 = arith.constant 2 : i32
    %90 = arith.index_cast %c2_i32 : i32 to index
    %c0_40 = arith.constant 0 : index
    %c0_41 = arith.constant 0 : index
    %91 = vector.load %arg1[%90, %c0_40, %c0_41] : memref<8x8x512xbf16, #tpu.memory_space<vmem>>, vector<1x8x512xbf16>
    %92 = vector.shape_cast %91 : vector<1x8x512xbf16> to vector<8x512xbf16>
    %93 = arith.extf %92 : vector<8x512xbf16> to vector<8x512xf32>
    %c0_42 = arith.constant 0 : index
    %c0_43 = arith.constant 0 : index
    %94 = vector.load %arg4[%c0_42, %c0_43] : memref<8x128xf32, #tpu.memory_space<vmem>>, vector<8x128xf32>
    %c0_44 = arith.constant 0 : index
    %c0_45 = arith.constant 0 : index
    %95 = vector.load %arg5[%c0_44, %c0_45] : memref<8x128xf32, #tpu.memory_space<vmem>>, vector<8x128xf32>
    %96 = arith.truncf %94 : vector<8x128xf32> to vector<8x128xbf16>
    %cst_46 = arith.constant dense<0.000000e+00> : vector<8x512xf32>
    %97 = tpu.matmul %96, %3, %cst_46 {dimension_numbers = #tpu.dot_dimension_numbers<[1], [0], [0], [1], [0, 0, 1, 1], [], []>} : vector<8x128xbf16>, vector<128x512xbf16>, vector<8x512xf32> -> vector<8x512xf32>
    %98 = arith.addf %93, %97 : vector<8x512xf32>
    %99 = vector.extract_strided_slice %98 {offsets = [0, 0], sizes = [8, 128], strides = [1, 1]} : vector<8x512xf32> to vector<8x128xf32>
    %cst_47 = arith.constant 0.000000e+00 : f32
    %100 = vector.broadcast %cst_47 : f32 to vector<8x128xf32>
    %101 = arith.subf %100, %99 : vector<8x128xf32>
    %102 = math.exp %101 : vector<8x128xf32>
    %cst_48 = arith.constant 1.000000e+00 : f32
    %103 = vector.broadcast %cst_48 : f32 to vector<8x128xf32>
    %104 = arith.addf %103, %102 : vector<8x128xf32>
    %105 = tpu.reciprocal %104 {approx = true} : vector<8x128xf32> -> vector<8x128xf32>
    %106 = vector.extract_strided_slice %98 {offsets = [0, 128], sizes = [8, 128], strides = [1, 1]} : vector<8x512xf32> to vector<8x128xf32>
    %cst_49 = arith.constant 0.000000e+00 : f32
    %107 = vector.broadcast %cst_49 : f32 to vector<8x128xf32>
    %108 = arith.subf %107, %106 : vector<8x128xf32>
    %109 = math.exp %108 : vector<8x128xf32>
    %cst_50 = arith.constant 1.000000e+00 : f32
    %110 = vector.broadcast %cst_50 : f32 to vector<8x128xf32>
    %111 = arith.addf %110, %109 : vector<8x128xf32>
    %112 = tpu.reciprocal %111 {approx = true} : vector<8x128xf32> -> vector<8x128xf32>
    %113 = vector.extract_strided_slice %98 {offsets = [0, 256], sizes = [8, 128], strides = [1, 1]} : vector<8x512xf32> to vector<8x128xf32>
    %114 = math.tanh %113 : vector<8x128xf32>
    %115 = vector.extract_strided_slice %98 {offsets = [0, 384], sizes = [8, 128], strides = [1, 1]} : vector<8x512xf32> to vector<8x128xf32>
    %cst_51 = arith.constant 0.000000e+00 : f32
    %116 = vector.broadcast %cst_51 : f32 to vector<8x128xf32>
    %117 = arith.subf %116, %115 : vector<8x128xf32>
    %118 = math.exp %117 : vector<8x128xf32>
    %cst_52 = arith.constant 1.000000e+00 : f32
    %119 = vector.broadcast %cst_52 : f32 to vector<8x128xf32>
    %120 = arith.addf %119, %118 : vector<8x128xf32>
    %121 = tpu.reciprocal %120 {approx = true} : vector<8x128xf32> -> vector<8x128xf32>
    %122 = arith.mulf %112, %95 : vector<8x128xf32>
    %123 = arith.mulf %105, %114 : vector<8x128xf32>
    %124 = arith.addf %122, %123 : vector<8x128xf32>
    %125 = math.tanh %124 : vector<8x128xf32>
    %126 = arith.mulf %121, %125 : vector<8x128xf32>
    %c0_53 = arith.constant 0 : index
    %c0_54 = arith.constant 0 : index
    %127 = vector.load %arg5[%c0_53, %c0_54] : memref<8x128xf32, #tpu.memory_space<vmem>>, vector<8x128xf32>
    tpu.vector_store %arg5[%c0_53, %c0_54], %124 {strides = array<i32>} : memref<8x128xf32, #tpu.memory_space<vmem>>, vector<8x128xf32>,
    %c0_55 = arith.constant 0 : index
    %c0_56 = arith.constant 0 : index
    %128 = vector.load %arg4[%c0_55, %c0_56] : memref<8x128xf32, #tpu.memory_space<vmem>>, vector<8x128xf32>
    tpu.vector_store %arg4[%c0_55, %c0_56], %126 {strides = array<i32>} : memref<8x128xf32, #tpu.memory_space<vmem>>, vector<8x128xf32>,
    %129 = arith.index_cast %c2_i32 : i32 to index
    %c0_57 = arith.constant 0 : index
    %c0_58 = arith.constant 0 : index
    %130 = vector.load %arg3[%129, %c0_57, %c0_58] : memref<8x8x128xf32, #tpu.memory_space<vmem>>, vector<1x8x128xf32>
    %131 = vector.shape_cast %130 : vector<1x8x128xf32> to vector<8x128xf32>
    %132 = vector.shape_cast %126 : vector<8x128xf32> to vector<1x8x128xf32>
    tpu.vector_store %arg3[%129, %c0_57, %c0_58], %132 {strides = array<i32>} : memref<8x8x128xf32, #tpu.memory_space<vmem>>, vector<1x8x128xf32>,
    %c3_i32 = arith.constant 3 : i32
    %133 = arith.index_cast %c3_i32 : i32 to index
    %c0_59 = arith.constant 0 : index
    %c0_60 = arith.constant 0 : index
    %134 = vector.load %arg1[%133, %c0_59, %c0_60] : memref<8x8x512xbf16, #tpu.memory_space<vmem>>, vector<1x8x512xbf16>
    %135 = vector.shape_cast %134 : vector<1x8x512xbf16> to vector<8x512xbf16>
    %136 = arith.extf %135 : vector<8x512xbf16> to vector<8x512xf32>
    %c0_61 = arith.constant 0 : index
    %c0_62 = arith.constant 0 : index
    %137 = vector.load %arg4[%c0_61, %c0_62] : memref<8x128xf32, #tpu.memory_space<vmem>>, vector<8x128xf32>
    %c0_63 = arith.constant 0 : index
    %c0_64 = arith.constant 0 : index
    %138 = vector.load %arg5[%c0_63, %c0_64] : memref<8x128xf32, #tpu.memory_space<vmem>>, vector<8x128xf32>
    %139 = arith.truncf %137 : vector<8x128xf32> to vector<8x128xbf16>
    %cst_65 = arith.constant dense<0.000000e+00> : vector<8x512xf32>
    %140 = tpu.matmul %139, %3, %cst_65 {dimension_numbers = #tpu.dot_dimension_numbers<[1], [0], [0], [1], [0, 0, 1, 1], [], []>} : vector<8x128xbf16>, vector<128x512xbf16>, vector<8x512xf32> -> vector<8x512xf32>
    %141 = arith.addf %136, %140 : vector<8x512xf32>
    %142 = vector.extract_strided_slice %141 {offsets = [0, 0], sizes = [8, 128], strides = [1, 1]} : vector<8x512xf32> to vector<8x128xf32>
    %cst_66 = arith.constant 0.000000e+00 : f32
    %143 = vector.broadcast %cst_66 : f32 to vector<8x128xf32>
    %144 = arith.subf %143, %142 : vector<8x128xf32>
    %145 = math.exp %144 : vector<8x128xf32>
    %cst_67 = arith.constant 1.000000e+00 : f32
    %146 = vector.broadcast %cst_67 : f32 to vector<8x128xf32>
    %147 = arith.addf %146, %145 : vector<8x128xf32>
    %148 = tpu.reciprocal %147 {approx = true} : vector<8x128xf32> -> vector<8x128xf32>
    %149 = vector.extract_strided_slice %141 {offsets = [0, 128], sizes = [8, 128], strides = [1, 1]} : vector<8x512xf32> to vector<8x128xf32>
    %cst_68 = arith.constant 0.000000e+00 : f32
    %150 = vector.broadcast %cst_68 : f32 to vector<8x128xf32>
    %151 = arith.subf %150, %149 : vector<8x128xf32>
    %152 = math.exp %151 : vector<8x128xf32>
    %cst_69 = arith.constant 1.000000e+00 : f32
    %153 = vector.broadcast %cst_69 : f32 to vector<8x128xf32>
    %154 = arith.addf %153, %152 : vector<8x128xf32>
    %155 = tpu.reciprocal %154 {approx = true} : vector<8x128xf32> -> vector<8x128xf32>
    %156 = vector.extract_strided_slice %141 {offsets = [0, 256], sizes = [8, 128], strides = [1, 1]} : vector<8x512xf32> to vector<8x128xf32>
    %157 = math.tanh %156 : vector<8x128xf32>
    %158 = vector.extract_strided_slice %141 {offsets = [0, 384], sizes = [8, 128], strides = [1, 1]} : vector<8x512xf32> to vector<8x128xf32>
    %cst_70 = arith.constant 0.000000e+00 : f32
    %159 = vector.broadcast %cst_70 : f32 to vector<8x128xf32>
    %160 = arith.subf %159, %158 : vector<8x128xf32>
    %161 = math.exp %160 : vector<8x128xf32>
    %cst_71 = arith.constant 1.000000e+00 : f32
    %162 = vector.broadcast %cst_71 : f32 to vector<8x128xf32>
    %163 = arith.addf %162, %161 : vector<8x128xf32>
    %164 = tpu.reciprocal %163 {approx = true} : vector<8x128xf32> -> vector<8x128xf32>
    %165 = arith.mulf %155, %138 : vector<8x128xf32>
    %166 = arith.mulf %148, %157 : vector<8x128xf32>
    %167 = arith.addf %165, %166 : vector<8x128xf32>
    %168 = math.tanh %167 : vector<8x128xf32>
    %169 = arith.mulf %164, %168 : vector<8x128xf32>
    %c0_72 = arith.constant 0 : index
    %c0_73 = arith.constant 0 : index
    %170 = vector.load %arg5[%c0_72, %c0_73] : memref<8x128xf32, #tpu.memory_space<vmem>>, vector<8x128xf32>
    tpu.vector_store %arg5[%c0_72, %c0_73], %167 {strides = array<i32>} : memref<8x128xf32, #tpu.memory_space<vmem>>, vector<8x128xf32>,
    %c0_74 = arith.constant 0 : index
    %c0_75 = arith.constant 0 : index
    %171 = vector.load %arg4[%c0_74, %c0_75] : memref<8x128xf32, #tpu.memory_space<vmem>>, vector<8x128xf32>
    tpu.vector_store %arg4[%c0_74, %c0_75], %169 {strides = array<i32>} : memref<8x128xf32, #tpu.memory_space<vmem>>, vector<8x128xf32>,
    %172 = arith.index_cast %c3_i32 : i32 to index
    %c0_76 = arith.constant 0 : index
    %c0_77 = arith.constant 0 : index
    %173 = vector.load %arg3[%172, %c0_76, %c0_77] : memref<8x8x128xf32, #tpu.memory_space<vmem>>, vector<1x8x128xf32>
    %174 = vector.shape_cast %173 : vector<1x8x128xf32> to vector<8x128xf32>
    %175 = vector.shape_cast %169 : vector<8x128xf32> to vector<1x8x128xf32>
    tpu.vector_store %arg3[%172, %c0_76, %c0_77], %175 {strides = array<i32>} : memref<8x8x128xf32, #tpu.memory_space<vmem>>, vector<1x8x128xf32>,
    %c4_i32 = arith.constant 4 : i32
    %176 = arith.index_cast %c4_i32 : i32 to index
    %c0_78 = arith.constant 0 : index
    %c0_79 = arith.constant 0 : index
    %177 = vector.load %arg1[%176, %c0_78, %c0_79] : memref<8x8x512xbf16, #tpu.memory_space<vmem>>, vector<1x8x512xbf16>
    %178 = vector.shape_cast %177 : vector<1x8x512xbf16> to vector<8x512xbf16>
    %179 = arith.extf %178 : vector<8x512xbf16> to vector<8x512xf32>
    %c0_80 = arith.constant 0 : index
    %c0_81 = arith.constant 0 : index
    %180 = vector.load %arg4[%c0_80, %c0_81] : memref<8x128xf32, #tpu.memory_space<vmem>>, vector<8x128xf32>
    %c0_82 = arith.constant 0 : index
    %c0_83 = arith.constant 0 : index
    %181 = vector.load %arg5[%c0_82, %c0_83] : memref<8x128xf32, #tpu.memory_space<vmem>>, vector<8x128xf32>
    %182 = arith.truncf %180 : vector<8x128xf32> to vector<8x128xbf16>
    %cst_84 = arith.constant dense<0.000000e+00> : vector<8x512xf32>
    %183 = tpu.matmul %182, %3, %cst_84 {dimension_numbers = #tpu.dot_dimension_numbers<[1], [0], [0], [1], [0, 0, 1, 1], [], []>} : vector<8x128xbf16>, vector<128x512xbf16>, vector<8x512xf32> -> vector<8x512xf32>
    %184 = arith.addf %179, %183 : vector<8x512xf32>
    %185 = vector.extract_strided_slice %184 {offsets = [0, 0], sizes = [8, 128], strides = [1, 1]} : vector<8x512xf32> to vector<8x128xf32>
    %cst_85 = arith.constant 0.000000e+00 : f32
    %186 = vector.broadcast %cst_85 : f32 to vector<8x128xf32>
    %187 = arith.subf %186, %185 : vector<8x128xf32>
    %188 = math.exp %187 : vector<8x128xf32>
    %cst_86 = arith.constant 1.000000e+00 : f32
    %189 = vector.broadcast %cst_86 : f32 to vector<8x128xf32>
    %190 = arith.addf %189, %188 : vector<8x128xf32>
    %191 = tpu.reciprocal %190 {approx = true} : vector<8x128xf32> -> vector<8x128xf32>
    %192 = vector.extract_strided_slice %184 {offsets = [0, 128], sizes = [8, 128], strides = [1, 1]} : vector<8x512xf32> to vector<8x128xf32>
    %cst_87 = arith.constant 0.000000e+00 : f32
    %193 = vector.broadcast %cst_87 : f32 to vector<8x128xf32>
    %194 = arith.subf %193, %192 : vector<8x128xf32>
    %195 = math.exp %194 : vector<8x128xf32>
    %cst_88 = arith.constant 1.000000e+00 : f32
    %196 = vector.broadcast %cst_88 : f32 to vector<8x128xf32>
    %197 = arith.addf %196, %195 : vector<8x128xf32>
    %198 = tpu.reciprocal %197 {approx = true} : vector<8x128xf32> -> vector<8x128xf32>
    %199 = vector.extract_strided_slice %184 {offsets = [0, 256], sizes = [8, 128], strides = [1, 1]} : vector<8x512xf32> to vector<8x128xf32>
    %200 = math.tanh %199 : vector<8x128xf32>
    %201 = vector.extract_strided_slice %184 {offsets = [0, 384], sizes = [8, 128], strides = [1, 1]} : vector<8x512xf32> to vector<8x128xf32>
    %cst_89 = arith.constant 0.000000e+00 : f32
    %202 = vector.broadcast %cst_89 : f32 to vector<8x128xf32>
    %203 = arith.subf %202, %201 : vector<8x128xf32>
    %204 = math.exp %203 : vector<8x128xf32>
    %cst_90 = arith.constant 1.000000e+00 : f32
    %205 = vector.broadcast %cst_90 : f32 to vector<8x128xf32>
    %206 = arith.addf %205, %204 : vector<8x128xf32>
    %207 = tpu.reciprocal %206 {approx = true} : vector<8x128xf32> -> vector<8x128xf32>
    %208 = arith.mulf %198, %181 : vector<8x128xf32>
    %209 = arith.mulf %191, %200 : vector<8x128xf32>
    %210 = arith.addf %208, %209 : vector<8x128xf32>
    %211 = math.tanh %210 : vector<8x128xf32>
    %212 = arith.mulf %207, %211 : vector<8x128xf32>
    %c0_91 = arith.constant 0 : index
    %c0_92 = arith.constant 0 : index
    %213 = vector.load %arg5[%c0_91, %c0_92] : memref<8x128xf32, #tpu.memory_space<vmem>>, vector<8x128xf32>
    tpu.vector_store %arg5[%c0_91, %c0_92], %210 {strides = array<i32>} : memref<8x128xf32, #tpu.memory_space<vmem>>, vector<8x128xf32>,
    %c0_93 = arith.constant 0 : index
    %c0_94 = arith.constant 0 : index
    %214 = vector.load %arg4[%c0_93, %c0_94] : memref<8x128xf32, #tpu.memory_space<vmem>>, vector<8x128xf32>
    tpu.vector_store %arg4[%c0_93, %c0_94], %212 {strides = array<i32>} : memref<8x128xf32, #tpu.memory_space<vmem>>, vector<8x128xf32>,
    %215 = arith.index_cast %c4_i32 : i32 to index
    %c0_95 = arith.constant 0 : index
    %c0_96 = arith.constant 0 : index
    %216 = vector.load %arg3[%215, %c0_95, %c0_96] : memref<8x8x128xf32, #tpu.memory_space<vmem>>, vector<1x8x128xf32>
    %217 = vector.shape_cast %216 : vector<1x8x128xf32> to vector<8x128xf32>
    %218 = vector.shape_cast %212 : vector<8x128xf32> to vector<1x8x128xf32>
    tpu.vector_store %arg3[%215, %c0_95, %c0_96], %218 {strides = array<i32>} : memref<8x8x128xf32, #tpu.memory_space<vmem>>, vector<1x8x128xf32>,
    %c5_i32 = arith.constant 5 : i32
    %219 = arith.index_cast %c5_i32 : i32 to index
    %c0_97 = arith.constant 0 : index
    %c0_98 = arith.constant 0 : index
    %220 = vector.load %arg1[%219, %c0_97, %c0_98] : memref<8x8x512xbf16, #tpu.memory_space<vmem>>, vector<1x8x512xbf16>
    %221 = vector.shape_cast %220 : vector<1x8x512xbf16> to vector<8x512xbf16>
    %222 = arith.extf %221 : vector<8x512xbf16> to vector<8x512xf32>
    %c0_99 = arith.constant 0 : index
    %c0_100 = arith.constant 0 : index
    %223 = vector.load %arg4[%c0_99, %c0_100] : memref<8x128xf32, #tpu.memory_space<vmem>>, vector<8x128xf32>
    %c0_101 = arith.constant 0 : index
    %c0_102 = arith.constant 0 : index
    %224 = vector.load %arg5[%c0_101, %c0_102] : memref<8x128xf32, #tpu.memory_space<vmem>>, vector<8x128xf32>
    %225 = arith.truncf %223 : vector<8x128xf32> to vector<8x128xbf16>
    %cst_103 = arith.constant dense<0.000000e+00> : vector<8x512xf32>
    %226 = tpu.matmul %225, %3, %cst_103 {dimension_numbers = #tpu.dot_dimension_numbers<[1], [0], [0], [1], [0, 0, 1, 1], [], []>} : vector<8x128xbf16>, vector<128x512xbf16>, vector<8x512xf32> -> vector<8x512xf32>
    %227 = arith.addf %222, %226 : vector<8x512xf32>
    %228 = vector.extract_strided_slice %227 {offsets = [0, 0], sizes = [8, 128], strides = [1, 1]} : vector<8x512xf32> to vector<8x128xf32>
    %cst_104 = arith.constant 0.000000e+00 : f32
    %229 = vector.broadcast %cst_104 : f32 to vector<8x128xf32>
    %230 = arith.subf %229, %228 : vector<8x128xf32>
    %231 = math.exp %230 : vector<8x128xf32>
    %cst_105 = arith.constant 1.000000e+00 : f32
    %232 = vector.broadcast %cst_105 : f32 to vector<8x128xf32>
    %233 = arith.addf %232, %231 : vector<8x128xf32>
    %234 = tpu.reciprocal %233 {approx = true} : vector<8x128xf32> -> vector<8x128xf32>
    %235 = vector.extract_strided_slice %227 {offsets = [0, 128], sizes = [8, 128], strides = [1, 1]} : vector<8x512xf32> to vector<8x128xf32>
    %cst_106 = arith.constant 0.000000e+00 : f32
    %236 = vector.broadcast %cst_106 : f32 to vector<8x128xf32>
    %237 = arith.subf %236, %235 : vector<8x128xf32>
    %238 = math.exp %237 : vector<8x128xf32>
    %cst_107 = arith.constant 1.000000e+00 : f32
    %239 = vector.broadcast %cst_107 : f32 to vector<8x128xf32>
    %240 = arith.addf %239, %238 : vector<8x128xf32>
    %241 = tpu.reciprocal %240 {approx = true} : vector<8x128xf32> -> vector<8x128xf32>
    %242 = vector.extract_strided_slice %227 {offsets = [0, 256], sizes = [8, 128], strides = [1, 1]} : vector<8x512xf32> to vector<8x128xf32>
    %243 = math.tanh %242 : vector<8x128xf32>
    %244 = vector.extract_strided_slice %227 {offsets = [0, 384], sizes = [8, 128], strides = [1, 1]} : vector<8x512xf32> to vector<8x128xf32>
    %cst_108 = arith.constant 0.000000e+00 : f32
    %245 = vector.broadcast %cst_108 : f32 to vector<8x128xf32>
    %246 = arith.subf %245, %244 : vector<8x128xf32>
    %247 = math.exp %246 : vector<8x128xf32>
    %cst_109 = arith.constant 1.000000e+00 : f32
    %248 = vector.broadcast %cst_109 : f32 to vector<8x128xf32>
    %249 = arith.addf %248, %247 : vector<8x128xf32>
    %250 = tpu.reciprocal %249 {approx = true} : vector<8x128xf32> -> vector<8x128xf32>
    %251 = arith.mulf %241, %224 : vector<8x128xf32>
    %252 = arith.mulf %234, %243 : vector<8x128xf32>
    %253 = arith.addf %251, %252 : vector<8x128xf32>
    %254 = math.tanh %253 : vector<8x128xf32>
    %255 = arith.mulf %250, %254 : vector<8x128xf32>
    %c0_110 = arith.constant 0 : index
    %c0_111 = arith.constant 0 : index
    %256 = vector.load %arg5[%c0_110, %c0_111] : memref<8x128xf32, #tpu.memory_space<vmem>>, vector<8x128xf32>
    tpu.vector_store %arg5[%c0_110, %c0_111], %253 {strides = array<i32>} : memref<8x128xf32, #tpu.memory_space<vmem>>, vector<8x128xf32>,
    %c0_112 = arith.constant 0 : index
    %c0_113 = arith.constant 0 : index
    %257 = vector.load %arg4[%c0_112, %c0_113] : memref<8x128xf32, #tpu.memory_space<vmem>>, vector<8x128xf32>
    tpu.vector_store %arg4[%c0_112, %c0_113], %255 {strides = array<i32>} : memref<8x128xf32, #tpu.memory_space<vmem>>, vector<8x128xf32>,
    %258 = arith.index_cast %c5_i32 : i32 to index
    %c0_114 = arith.constant 0 : index
    %c0_115 = arith.constant 0 : index
    %259 = vector.load %arg3[%258, %c0_114, %c0_115] : memref<8x8x128xf32, #tpu.memory_space<vmem>>, vector<1x8x128xf32>
    %260 = vector.shape_cast %259 : vector<1x8x128xf32> to vector<8x128xf32>
    %261 = vector.shape_cast %255 : vector<8x128xf32> to vector<1x8x128xf32>
    tpu.vector_store %arg3[%258, %c0_114, %c0_115], %261 {strides = array<i32>} : memref<8x8x128xf32, #tpu.memory_space<vmem>>, vector<1x8x128xf32>,
    %c6_i32 = arith.constant 6 : i32
    %262 = arith.index_cast %c6_i32 : i32 to index
    %c0_116 = arith.constant 0 : index
    %c0_117 = arith.constant 0 : index
    %263 = vector.load %arg1[%262, %c0_116, %c0_117] : memref<8x8x512xbf16, #tpu.memory_space<vmem>>, vector<1x8x512xbf16>
    %264 = vector.shape_cast %263 : vector<1x8x512xbf16> to vector<8x512xbf16>
    %265 = arith.extf %264 : vector<8x512xbf16> to vector<8x512xf32>
    %c0_118 = arith.constant 0 : index
    %c0_119 = arith.constant 0 : index
    %266 = vector.load %arg4[%c0_118, %c0_119] : memref<8x128xf32, #tpu.memory_space<vmem>>, vector<8x128xf32>
    %c0_120 = arith.constant 0 : index
    %c0_121 = arith.constant 0 : index
    %267 = vector.load %arg5[%c0_120, %c0_121] : memref<8x128xf32, #tpu.memory_space<vmem>>, vector<8x128xf32>
    %268 = arith.truncf %266 : vector<8x128xf32> to vector<8x128xbf16>
    %cst_122 = arith.constant dense<0.000000e+00> : vector<8x512xf32>
    %269 = tpu.matmul %268, %3, %cst_122 {dimension_numbers = #tpu.dot_dimension_numbers<[1], [0], [0], [1], [0, 0, 1, 1], [], []>} : vector<8x128xbf16>, vector<128x512xbf16>, vector<8x512xf32> -> vector<8x512xf32>
    %270 = arith.addf %265, %269 : vector<8x512xf32>
    %271 = vector.extract_strided_slice %270 {offsets = [0, 0], sizes = [8, 128], strides = [1, 1]} : vector<8x512xf32> to vector<8x128xf32>
    %cst_123 = arith.constant 0.000000e+00 : f32
    %272 = vector.broadcast %cst_123 : f32 to vector<8x128xf32>
    %273 = arith.subf %272, %271 : vector<8x128xf32>
    %274 = math.exp %273 : vector<8x128xf32>
    %cst_124 = arith.constant 1.000000e+00 : f32
    %275 = vector.broadcast %cst_124 : f32 to vector<8x128xf32>
    %276 = arith.addf %275, %274 : vector<8x128xf32>
    %277 = tpu.reciprocal %276 {approx = true} : vector<8x128xf32> -> vector<8x128xf32>
    %278 = vector.extract_strided_slice %270 {offsets = [0, 128], sizes = [8, 128], strides = [1, 1]} : vector<8x512xf32> to vector<8x128xf32>
    %cst_125 = arith.constant 0.000000e+00 : f32
    %279 = vector.broadcast %cst_125 : f32 to vector<8x128xf32>
    %280 = arith.subf %279, %278 : vector<8x128xf32>
    %281 = math.exp %280 : vector<8x128xf32>
    %cst_126 = arith.constant 1.000000e+00 : f32
    %282 = vector.broadcast %cst_126 : f32 to vector<8x128xf32>
    %283 = arith.addf %282, %281 : vector<8x128xf32>
    %284 = tpu.reciprocal %283 {approx = true} : vector<8x128xf32> -> vector<8x128xf32>
    %285 = vector.extract_strided_slice %270 {offsets = [0, 256], sizes = [8, 128], strides = [1, 1]} : vector<8x512xf32> to vector<8x128xf32>
    %286 = math.tanh %285 : vector<8x128xf32>
    %287 = vector.extract_strided_slice %270 {offsets = [0, 384], sizes = [8, 128], strides = [1, 1]} : vector<8x512xf32> to vector<8x128xf32>
    %cst_127 = arith.constant 0.000000e+00 : f32
    %288 = vector.broadcast %cst_127 : f32 to vector<8x128xf32>
    %289 = arith.subf %288, %287 : vector<8x128xf32>
    %290 = math.exp %289 : vector<8x128xf32>
    %cst_128 = arith.constant 1.000000e+00 : f32
    %291 = vector.broadcast %cst_128 : f32 to vector<8x128xf32>
    %292 = arith.addf %291, %290 : vector<8x128xf32>
    %293 = tpu.reciprocal %292 {approx = true} : vector<8x128xf32> -> vector<8x128xf32>
    %294 = arith.mulf %284, %267 : vector<8x128xf32>
    %295 = arith.mulf %277, %286 : vector<8x128xf32>
    %296 = arith.addf %294, %295 : vector<8x128xf32>
    %297 = math.tanh %296 : vector<8x128xf32>
    %298 = arith.mulf %293, %297 : vector<8x128xf32>
    %c0_129 = arith.constant 0 : index
    %c0_130 = arith.constant 0 : index
    %299 = vector.load %arg5[%c0_129, %c0_130] : memref<8x128xf32, #tpu.memory_space<vmem>>, vector<8x128xf32>
    tpu.vector_store %arg5[%c0_129, %c0_130], %296 {strides = array<i32>} : memref<8x128xf32, #tpu.memory_space<vmem>>, vector<8x128xf32>,
    %c0_131 = arith.constant 0 : index
    %c0_132 = arith.constant 0 : index
    %300 = vector.load %arg4[%c0_131, %c0_132] : memref<8x128xf32, #tpu.memory_space<vmem>>, vector<8x128xf32>
    tpu.vector_store %arg4[%c0_131, %c0_132], %298 {strides = array<i32>} : memref<8x128xf32, #tpu.memory_space<vmem>>, vector<8x128xf32>,
    %301 = arith.index_cast %c6_i32 : i32 to index
    %c0_133 = arith.constant 0 : index
    %c0_134 = arith.constant 0 : index
    %302 = vector.load %arg3[%301, %c0_133, %c0_134] : memref<8x8x128xf32, #tpu.memory_space<vmem>>, vector<1x8x128xf32>
    %303 = vector.shape_cast %302 : vector<1x8x128xf32> to vector<8x128xf32>
    %304 = vector.shape_cast %298 : vector<8x128xf32> to vector<1x8x128xf32>
    tpu.vector_store %arg3[%301, %c0_133, %c0_134], %304 {strides = array<i32>} : memref<8x8x128xf32, #tpu.memory_space<vmem>>, vector<1x8x128xf32>,
    %c7_i32 = arith.constant 7 : i32
    %305 = arith.index_cast %c7_i32 : i32 to index
    %c0_135 = arith.constant 0 : index
    %c0_136 = arith.constant 0 : index
    %306 = vector.load %arg1[%305, %c0_135, %c0_136] : memref<8x8x512xbf16, #tpu.memory_space<vmem>>, vector<1x8x512xbf16>
    %307 = vector.shape_cast %306 : vector<1x8x512xbf16> to vector<8x512xbf16>
    %308 = arith.extf %307 : vector<8x512xbf16> to vector<8x512xf32>
    %c0_137 = arith.constant 0 : index
    %c0_138 = arith.constant 0 : index
    %309 = vector.load %arg4[%c0_137, %c0_138] : memref<8x128xf32, #tpu.memory_space<vmem>>, vector<8x128xf32>
    %c0_139 = arith.constant 0 : index
    %c0_140 = arith.constant 0 : index
    %310 = vector.load %arg5[%c0_139, %c0_140] : memref<8x128xf32, #tpu.memory_space<vmem>>, vector<8x128xf32>
    %311 = arith.truncf %309 : vector<8x128xf32> to vector<8x128xbf16>
    %cst_141 = arith.constant dense<0.000000e+00> : vector<8x512xf32>
    %312 = tpu.matmul %311, %3, %cst_141 {dimension_numbers = #tpu.dot_dimension_numbers<[1], [0], [0], [1], [0, 0, 1, 1], [], []>} : vector<8x128xbf16>, vector<128x512xbf16>, vector<8x512xf32> -> vector<8x512xf32>
    %313 = arith.addf %308, %312 : vector<8x512xf32>
    %314 = vector.extract_strided_slice %313 {offsets = [0, 0], sizes = [8, 128], strides = [1, 1]} : vector<8x512xf32> to vector<8x128xf32>
    %cst_142 = arith.constant 0.000000e+00 : f32
    %315 = vector.broadcast %cst_142 : f32 to vector<8x128xf32>
    %316 = arith.subf %315, %314 : vector<8x128xf32>
    %317 = math.exp %316 : vector<8x128xf32>
    %cst_143 = arith.constant 1.000000e+00 : f32
    %318 = vector.broadcast %cst_143 : f32 to vector<8x128xf32>
    %319 = arith.addf %318, %317 : vector<8x128xf32>
    %320 = tpu.reciprocal %319 {approx = true} : vector<8x128xf32> -> vector<8x128xf32>
    %321 = vector.extract_strided_slice %313 {offsets = [0, 128], sizes = [8, 128], strides = [1, 1]} : vector<8x512xf32> to vector<8x128xf32>
    %cst_144 = arith.constant 0.000000e+00 : f32
    %322 = vector.broadcast %cst_144 : f32 to vector<8x128xf32>
    %323 = arith.subf %322, %321 : vector<8x128xf32>
    %324 = math.exp %323 : vector<8x128xf32>
    %cst_145 = arith.constant 1.000000e+00 : f32
    %325 = vector.broadcast %cst_145 : f32 to vector<8x128xf32>
    %326 = arith.addf %325, %324 : vector<8x128xf32>
    %327 = tpu.reciprocal %326 {approx = true} : vector<8x128xf32> -> vector<8x128xf32>
    %328 = vector.extract_strided_slice %313 {offsets = [0, 256], sizes = [8, 128], strides = [1, 1]} : vector<8x512xf32> to vector<8x128xf32>
    %329 = math.tanh %328 : vector<8x128xf32>
    %330 = vector.extract_strided_slice %313 {offsets = [0, 384], sizes = [8, 128], strides = [1, 1]} : vector<8x512xf32> to vector<8x128xf32>
    %cst_146 = arith.constant 0.000000e+00 : f32
    %331 = vector.broadcast %cst_146 : f32 to vector<8x128xf32>
    %332 = arith.subf %331, %330 : vector<8x128xf32>
    %333 = math.exp %332 : vector<8x128xf32>
    %cst_147 = arith.constant 1.000000e+00 : f32
    %334 = vector.broadcast %cst_147 : f32 to vector<8x128xf32>
    %335 = arith.addf %334, %333 : vector<8x128xf32>
    %336 = tpu.reciprocal %335 {approx = true} : vector<8x128xf32> -> vector<8x128xf32>
    %337 = arith.mulf %327, %310 : vector<8x128xf32>
    %338 = arith.mulf %320, %329 : vector<8x128xf32>
    %339 = arith.addf %337, %338 : vector<8x128xf32>
    %340 = math.tanh %339 : vector<8x128xf32>
    %341 = arith.mulf %336, %340 : vector<8x128xf32>
    %c0_148 = arith.constant 0 : index
    %c0_149 = arith.constant 0 : index
    %342 = vector.load %arg5[%c0_148, %c0_149] : memref<8x128xf32, #tpu.memory_space<vmem>>, vector<8x128xf32>
    tpu.vector_store %arg5[%c0_148, %c0_149], %339 {strides = array<i32>} : memref<8x128xf32, #tpu.memory_space<vmem>>, vector<8x128xf32>,
    %c0_150 = arith.constant 0 : index
    %c0_151 = arith.constant 0 : index
    %343 = vector.load %arg4[%c0_150, %c0_151] : memref<8x128xf32, #tpu.memory_space<vmem>>, vector<8x128xf32>
    tpu.vector_store %arg4[%c0_150, %c0_151], %341 {strides = array<i32>} : memref<8x128xf32, #tpu.memory_space<vmem>>, vector<8x128xf32>,
    %344 = arith.index_cast %c7_i32 : i32 to index
    %c0_152 = arith.constant 0 : index
    %c0_153 = arith.constant 0 : index
    %345 = vector.load %arg3[%344, %c0_152, %c0_153] : memref<8x8x128xf32, #tpu.memory_space<vmem>>, vector<1x8x128xf32>
    %346 = vector.shape_cast %345 : vector<1x8x128xf32> to vector<8x128xf32>
    %347 = vector.shape_cast %341 : vector<8x128xf32> to vector<1x8x128xf32>
    tpu.vector_store %arg3[%344, %c0_152, %c0_153], %347 {strides = array<i32>} : memref<8x8x128xf32, #tpu.memory_space<vmem>>, vector<1x8x128xf32>,
    %c8_i32 = arith.constant 8 : i32
    return
  }
  func.func @transform_0(%arg0: i32) -> (i32, i32, i32) {
    %c0_i32 = arith.constant 0 : i32
    %c0_i32_0 = arith.constant 0 : i32
    %c0_i32_1 = arith.constant 0 : i32
    return %arg0, %c0_i32, %c0_i32_0 : i32, i32, i32
  }
  func.func @transform_1(%arg0: i32) -> (i32, i32) {
    %c0_i32 = arith.constant 0 : i32
    %c0_i32_0 = arith.constant 0 : i32
    %c0_i32_1 = arith.constant 0 : i32
    return %c0_i32, %c0_i32_0 : i32, i32
  }
  func.func @transform_2(%arg0: i32) -> (i32, i32, i32) {
    %c0_i32 = arith.constant 0 : i32
    %c0_i32_0 = arith.constant 0 : i32
    %c0_i32_1 = arith.constant 0 : i32
    return %arg0, %c0_i32, %c0_i32_0 : i32, i32, i32
  }
}

</mosaic_0001>

<bundles_post_ra>
// kernel: lstm_forward.1
= control target key start
LH: loop header
LB: loop body
LE: loop exit
PB: predicated region body
PF: predicated region fallthrough
CT: control target
= control target key end

     0   :  { %s1681_s9 = smov 0   ;;  %s2264_s0 = inlined_call_operand.vmem [shape: bf16[16,8,512], index: 0, kind: input, shape index: {}]   ;;  %s2265_s1 = inlined_call_operand.vmem [shape: bf16[128,512], index: 1, kind: input, shape index: {}]   ;;  %s2266_s2 = inlined_call_operand.vmem [shape: f32[16,8,128], index: 2, kind: output, shape index: {}]  }
   0x1 LB: > { %s1371_s10 = sadd.s32 4294967295, %s1662_s9   ;;  %p1375_p0 = scmp.ge.s32.totalorder %s1662_s9, 1  ;;  %s1662_s9 = sphi %s1681_s9, %s12_s9  }
   0x2   : > { %p114_p1 = scmp.lt.s32.totalorder %s1662_s9, 3 }
   0x4   : > { %p115_p2 = pnand %p1375_p0, %p114_p1 }
   0x5   : > { %s1376_s11 = sshll.u32 (!%p115_p2), %s1371_s10, 3  ;;  %p1381_p4 = scmp.ne.s32.totalorder (!%p115_p2), %s1371_s10, 0 }
   0x6   : > { %118 = sbr.rel (%p115_p2) target bundleno = 2149 (0x865), region = 28  ;;  %p138_p3 = scmp.lt.s32.totalorder (!%p115_p2), %s1376_s11, 15 }
   0xd   : > { %s2268_s11 = smov (!%p138_p3, %s1376_s11), 15  ;;  %154 = sbr.rel (%p1381_p4) target bundleno = 20 (0x14), region = 32 }
   0xe   : > { %s1437_s12 = sshll.u32 %s2268_s11, 4  ;;  %s1380_s13 = sshll.u32 %s2268_s11, 3  ;;  %v1664_v0 = vmov (!%p1381_p4), 0.0  }
   0xf   : > { %s1692_s16 = scalar_lea.vmem %s2264_s0, %s1437_s12  ;;  %s1697_s19 = scalar_lea.vmem %s2266_s2, %s1380_s13  ;;  %155 = vst [vmem:[#allocation2] sm:$0xff] (!%p1381_p4), %v1664_v0  ;;  %156 = vst [vmem:[#allocation3] sm:$0xff] (!%p1381_p4), %v1664_v0 }
  0x14 PF: > { %v1702_v1 = vld [vmem:[%s2265_s1 + $0x4] ss:$16 sps:$4 sm:$0xff]   ;;  %v1707_v2 = vld [vmem:[%s2265_s1] ss:$16 sps:$4 sm:$0xff]   ;;  %v1665_v3 = vmov 0   ;;  %v190_v40 = vld [vmem:[%s1692_s16 + $0x8] sm:$0xff] }
  0x15   : > { %390 = vmatprep.mubr.bf16.mxu0 %v1665_v3  ;;  %431 = vmatprep.mubr.bf16.mxu1 %v1665_v3  ;;  %v1715_v4 = vld [vmem:[%s2265_s1 + $0x24] ss:$16 sps:$4 sm:$0xff]   ;;  %v1721_v5 = vld [vmem:[%s2265_s1 + $0x20] ss:$16 sps:$4 sm:$0xff]   ;;  %v1732_v7 = vld [vmem:[%s2265_s1 + $0xc] ss:$16 sps:$4 sm:$0xff]   ;;  %v194_v47 = vunpack.c.h.bf16 %v190_v40  ;;  %v193_v57 = vunpack.c.l.bf16 %v190_v40 }
  0x16   : > { %358 = vmatprep.subr.bf16.mxu0 %v1702_v1  ;;  %v1727_v6 = vld [vmem:[%s2265_s1 + $0x44] ss:$16 sps:$4 sm:$0xff]   ;;  %v1737_v8 = vld [vmem:[%s2265_s1 + $0x8] ss:$16 sps:$4 sm:$0xff]   ;;  %v1743_v9 = vld [vmem:[%s2265_s1 + $0x40] ss:$16 sps:$4 sm:$0xff]   ;;  %399 = vmatprep.subr.bf16.mxu1 %v1732_v7 }
  0x17   : > { %359 = vmatpush1.bf16.msra.mxu0 %v1707_v2  ;;  %v1750_v10 = vld [vmem:[%s2265_s1 + $0x64] ss:$16 sps:$4 sm:$0xff]   ;;  %400 = vmatpush1.bf16.msra.mxu1 %v1737_v8  ;;  %v1756_v11 = vld [vmem:[%s2265_s1 + $0x2c] ss:$16 sps:$4 sm:$0xff]   ;;  %v1761_v12 = vld [vmem:[%s2265_s1 + $0x28] ss:$16 sps:$4 sm:$0xff]  }
  0x18   : > { %360 = vmatprep.subr.bf16.mxu0 %v1715_v4  ;;  %401 = vmatprep.subr.bf16.mxu1 %v1756_v11  ;;  %v1768_v13 = vld [vmem:[%s2265_s1 + $0x60] ss:$16 sps:$4 sm:$0xff]   ;;  %v1773_v14 = vld [vmem:[%s2265_s1 + $0x84] ss:$16 sps:$4 sm:$0xff]   ;;  %v1778_v15 = vld [vmem:[%s2265_s1 + $0x4c] ss:$16 sps:$4 sm:$0xff]  }
  0x19   : > { %v1785_v16 = vld [vmem:[%s2265_s1 + $0x48] ss:$16 sps:$4 sm:$0xff]   ;;  %v1791_v17 = vld [vmem:[%s2265_s1 + $0x6c] ss:$16 sps:$4 sm:$0xff]   ;;  %v1797_v18 = vld [vmem:[%s2265_s1 + $0x80] ss:$16 sps:$4 sm:$0xff]  }
  0x1a   : > { %v1803_v19 = vld [vmem:[%s2265_s1 + $0xa4] ss:$16 sps:$4 sm:$0xff]   ;;  %v1809_v20 = vld [vmem:[%s2265_s1 + $0x68] ss:$16 sps:$4 sm:$0xff]   ;;  %v1815_v21 = vld [vmem:[%s2265_s1 + $0x8c] ss:$16 sps:$4 sm:$0xff]  }
  0x1b   : > { %361 = vmatpush1.bf16.msra.mxu0 %v1721_v5  ;;  %402 = vmatpush1.bf16.msra.mxu1 %v1761_v12  ;;  %v1820_v22 = vld [vmem:[%s2265_s1 + $0xa0] ss:$16 sps:$4 sm:$0xff]   ;;  %v1826_v23 = vld [vmem:[%s2265_s1 + $0xc4] ss:$16 sps:$4 sm:$0xff]   ;;  %v1833_v24 = vld [vmem:[%s2265_s1 + $0x88] ss:$16 sps:$4 sm:$0xff]  }
  0x1c   : > { %362 = vmatprep.subr.bf16.mxu0 %v1727_v6  ;;  %403 = vmatprep.subr.bf16.mxu1 %v1778_v15  ;;  %v1839_v25 = vld [vmem:[%s2265_s1 + $0xac] ss:$16 sps:$4 sm:$0xff]   ;;  %v1845_v26 = vld [vmem:[%s2265_s1 + $0xc0] ss:$16 sps:$4 sm:$0xff]   ;;  %v1851_v27 = vld [vmem:[%s2265_s1 + $0xe4] ss:$16 sps:$4 sm:$0xff]  }
  0x1d   : > { %v1857_v28 = vld [vmem:[%s2265_s1 + $0xa8] ss:$16 sps:$4 sm:$0xff]   ;;  %v1863_v29 = vld [vmem:[%s2265_s1 + $0xcc] ss:$16 sps:$4 sm:$0xff]   ;;  %v1869_v30 = vld [vmem:[%s2265_s1 + $0xe0] ss:$16 sps:$4 sm:$0xff]  }
  0x1e   : > { %v195_v31 = vld [vmem:[#allocation2] sm:$0xff]  ;;  %v1876_v32 = vld [vmem:[%s2265_s1 + $0xc8] ss:$16 sps:$4 sm:$0xff]   ;;  %v1882_v33 = vld [vmem:[%s2265_s1 + $0xec] ss:$16 sps:$4 sm:$0xff]  }
  0x1f   : > { %363 = vmatpush1.bf16.msra.mxu0 %v1743_v9  ;;  %404 = vmatpush1.bf16.msra.mxu1 %v1785_v16  ;;  %v197_v34 = vpack.c.bf16 %v195_v31, %v195_v31  ;;  %v1889_v35 = vld [vmem:[%s2265_s1 + $0xe8] ss:$16 sps:$4 sm:$0xff]   ;;  %v189_v36 = vld [vmem:[%s1692_s16] sm:$0xff] }
  0x20   : > { %364 = vmatprep.subr.bf16.mxu0 %v1750_v10  ;;  %405 = vmatprep.subr.bf16.mxu1 %v1791_v17  ;;  %v191_v37 = vunpack.c.l.bf16 %v189_v36  ;;  %v192_v38 = vunpack.c.h.bf16 %v189_v36 }
  0x23   : > { %365 = vmatpush1.bf16.msra.mxu0 %v1768_v13  ;;  %406 = vmatpush1.bf16.msra.mxu1 %v1809_v20 }
  0x24   : > { %366 = vmatprep.subr.bf16.mxu0 %v1773_v14  ;;  %407 = vmatprep.subr.bf16.mxu1 %v1815_v21 }
  0x27   : > { %367 = vmatpush1.bf16.msra.mxu0 %v1797_v18  ;;  %408 = vmatpush1.bf16.msra.mxu1 %v1833_v24 }
  0x28   : > { %368 = vmatprep.subr.bf16.mxu0 %v1803_v19  ;;  %409 = vmatprep.subr.bf16.mxu1 %v1839_v25 }
  0x2b   : > { %369 = vmatpush1.bf16.msra.mxu0 %v1820_v22  ;;  %410 = vmatpush1.bf16.msra.mxu1 %v1857_v28 }
  0x2c   : > { %370 = vmatprep.subr.bf16.mxu0 %v1826_v23  ;;  %411 = vmatprep.subr.bf16.mxu1 %v1863_v29 }
  0x2f   : > { %371 = vmatpush1.bf16.msra.mxu0 %v1845_v26  ;;  %412 = vmatpush1.bf16.msra.mxu1 %v1876_v32 }
  0x30   : > { %372 = vmatprep.subr.bf16.mxu0 %v1851_v27  ;;  %413 = vmatprep.subr.bf16.mxu1 %v1882_v33 }
  0x33   : > { %373 = vmatpush1.bf16.msra.mxu0 %v1869_v30  ;;  %414 = vmatpush1.bf16.msra.mxu1 %v1889_v35 }
  0x34   : > { %478 = vmatprep.subr.bf16.mxu0 %v1702_v1  ;;  %519 = vmatprep.subr.bf16.mxu1 %v1732_v7 }
  0x36   : > { %391 = vmatmul.mubr.bf16.vlgmr.msra.gmra.mrb[0].mxu0 %v197_v34  ;;  %432 = vmatmul.mubr.bf16.vlgmr.msra.gmra.mrb[0].mxu1 %v197_v34  ;;  %v196_v34 = vld [vmem:[#allocation3] sm:$0xff] }
  0x37   : > { %479 = vmatpush1.bf16.msra.mxu0 %v1707_v2  ;;  %510 = vmatprep.mubr.bf16.mxu0 %v1665_v3 }
  0x38   : > { %480 = vmatprep.subr.bf16.mxu0 %v1715_v4  ;;  %520 = vmatpush1.bf16.msra.mxu1 %v1737_v8 }
  0x39   : > { %521 = vmatprep.subr.bf16.mxu1 %v1756_v11  ;;  %551 = vmatprep.mubr.bf16.mxu1 %v1665_v3 }
  0x3b   : > { %481 = vmatpush1.bf16.msra.mxu0 %v1721_v5 }
  0x3c   : > { %482 = vmatprep.subr.bf16.mxu0 %v1727_v6  ;;  %522 = vmatpush1.bf16.msra.mxu1 %v1761_v12 }
  0x3d   : > { %523 = vmatprep.subr.bf16.mxu1 %v1778_v15 }
  0x3f   : > { %483 = vmatpush1.bf16.msra.mxu0 %v1743_v9 }
  0x40   : > { %484 = vmatprep.subr.bf16.mxu0 %v1750_v10  ;;  %524 = vmatpush1.bf16.msra.mxu1 %v1785_v16 }
  0x41   : > { %525 = vmatprep.subr.bf16.mxu1 %v1791_v17 }
  0x43   : > { %485 = vmatpush1.bf16.msra.mxu0 %v1768_v13 }
  0x44   : > { %486 = vmatprep.subr.bf16.mxu0 %v1773_v14  ;;  %526 = vmatpush1.bf16.msra.mxu1 %v1809_v20 }
  0x45   : > { %527 = vmatprep.subr.bf16.mxu1 %v1815_v21 }
  0x47   : > { %487 = vmatpush1.bf16.msra.mxu0 %v1797_v18 }
  0x48   : > { %488 = vmatprep.subr.bf16.mxu0 %v1803_v19  ;;  %528 = vmatpush1.bf16.msra.mxu1 %v1833_v24 }
  0x49   : > { %529 = vmatprep.subr.bf16.mxu1 %v1839_v25 }
  0x4b   : > { %489 = vmatpush1.bf16.msra.mxu0 %v1820_v22 }
  0x4c   : > { %490 = vmatprep.subr.bf16.mxu0 %v1826_v23  ;;  %530 = vmatpush1.bf16.msra.mxu1 %v1857_v28 }
  0x4d   : > { %531 = vmatprep.subr.bf16.mxu1 %v1863_v29 }
  0x4f   : > { %491 = vmatpush1.bf16.msra.mxu0 %v1845_v26 }
  0x50   : > { %492 = vmatprep.subr.bf16.mxu0 %v1851_v27  ;;  %532 = vmatpush1.bf16.msra.mxu1 %v1876_v32 }
  0x51   : > { %533 = vmatprep.subr.bf16.mxu1 %v1882_v33 }
  0x53   : > { %493 = vmatpush1.bf16.msra.mxu0 %v1869_v30 }
  0x54   : > { %599 = vmatprep.subr.bf16.mxu0 %v1702_v1  ;;  %534 = vmatpush1.bf16.msra.mxu1 %v1889_v35 }
  0x55   : > { %640 = vmatprep.subr.bf16.mxu1 %v1732_v7 }
 0x109   : > { %v392_v39 = vpop.f32.mrb[0].mxu0  ;;  %v433_v50 = vpop.f32.mrb[0].mxu1 }
 0x10a   : > { %v440_v41 = vadd.f32 %v392_v39, %v191_v37  ;;  %v394_v42 = vpop.f32.mrb[1].mxu0  ;;  %v435_v52 = vpop.f32.mrb[1].mxu1  ;;  %v442_v59 = vadd.f32 %v433_v50, %v193_v57 }
 0x10b   : > { %v441_v43 = vadd.f32 %v394_v42, %v192_v38  ;;  %v396_v44 = vpop.f32.mrb[2].mxu0  ;;  %v443_v53 = vadd.f32 %v435_v52, %v194_v47  ;;  %v437_v54 = vpop.f32.mrb[2].mxu1 }
 0x10c   : > { %v444_v45 = vsub.f32 0.0, %v440_v41  ;;  %v397_v46 = vpop.f32.mrb[3].mxu0  ;;  %v438_v55 = vpop.f32.mrb[3].mxu1 }
 0x10d   : > { %v449_v48 = vsub.f32 0.0, %v441_v43  ;;  %v455_v56 = vsub.f32 0.0, %v443_v53  ;;  %v1414_v46 = vld [vmem:[%s1692_s16 + $0x10] sm:$0xff] }
 0x10e   : > { %v445_v49 = vmul.f32 1.442695, %v444_v45  ;;  %v471_v47 = vunpack.c.l.bf16 %v1414_v46 }
 0x10f   : > { %v450_v51 = vmul.f32 1.442695, %v449_v48  ;;  %v456_v58 = vmul.f32 1.442695, %v455_v56  ;;  %v472_v48 = vunpack.c.h.bf16 %v1414_v46 }
 0x110   : > { %1496 = vpow2.f32 %v445_v49  ;;  %v1415_v49 = vld [vmem:[%s1692_s16 + $0x18] sm:$0xff] }
 0x111   : > { %1498 = vpow2.f32 %v450_v51  ;;  %v474_v56 = vunpack.c.h.bf16 %v1415_v49 }
 0x112   : > { %1500 = vpow2.f32 %v456_v58 }
 0x113   : > { %1502 = vtanh.f32 %v442_v59 }
 0x11a   : > { %v1497_v60 = vpop.eup %1496 }
 0x11b   : > { %v1499_v61 = vpop.eup %1498  ;;  %v447_v62 = vadd.f32 1.0, %v1497_v60 }
 0x11c   : > { %v452_v63 = vadd.f32 1.0, %v1499_v61  ;;  %v1501_v0 = vpop.eup %1500 }
 0x11d   : > { %1504 = vrcp.f32 %v447_v62  ;;  %v1503_v31 = vpop.eup %1502  ;;  %v458_v37 = vadd.f32 1.0, %v1501_v0 }
 0x11e   : > { %1506 = vrcp.f32 %v452_v63 }
 0x11f   : > { %1508 = vrcp.f32 %v458_v37 }
 0x127   : > { %v1505_v36 = vpop.eup %1504 }
 0x128   : > { %v1507_v38 = vpop.eup %1506  ;;  %v461_v39 = vmul.f32 %v1505_v36, %v1503_v31  ;;  %v473_v36 = vunpack.c.l.bf16 %v1415_v49 }
 0x129   : > { %v460_v41 = vmul.f32 %v1507_v38, %v196_v34  ;;  %v1509_v42 = vpop.eup %1508 }
 0x12b   : > { %v1931_v40 = vadd.f32 %v461_v39, %v460_v41 }
 0x12d   : > { %1510 = vtanh.f32 %v1931_v40 }
 0x137   : > { %v1511_v43 = vpop.eup %1510 }
 0x138   : > { %v464_v44 = vmul.f32 %v1511_v43, %v1509_v42 }
 0x13a   : > { %467 = vst [vmem:[%s1697_s19] sm:$0xff] %v464_v44  ;;  %v477_v45 = vpack.c.bf16 %v464_v44, %v464_v44 }
 0x13c   : > { %511 = vmatmul.mubr.bf16.vlgmr.msra.gmra.mrb[4].mxu0 %v477_v45  ;;  %552 = vmatmul.mubr.bf16.vlgmr.msra.gmra.mrb[4].mxu1 %v477_v45 }
 0x13d   : > { %600 = vmatpush1.bf16.msra.mxu0 %v1707_v2  ;;  %641 = vmatpush1.bf16.msra.mxu1 %v1737_v8 }
 0x13e   : > { %601 = vmatprep.subr.bf16.mxu0 %v1715_v4  ;;  %642 = vmatprep.subr.bf16.mxu1 %v1756_v11 }
 0x13f   : > { %631 = vmatprep.mubr.bf16.mxu0 %v1665_v3  ;;  %672 = vmatprep.mubr.bf16.mxu1 %v1665_v3 }
 0x141   : > { %602 = vmatpush1.bf16.msra.mxu0 %v1721_v5  ;;  %643 = vmatpush1.bf16.msra.mxu1 %v1761_v12 }
 0x142   : > { %603 = vmatprep.subr.bf16.mxu0 %v1727_v6  ;;  %644 = vmatprep.subr.bf16.mxu1 %v1778_v15 }
 0x145   : > { %604 = vmatpush1.bf16.msra.mxu0 %v1743_v9  ;;  %645 = vmatpush1.bf16.msra.mxu1 %v1785_v16 }
 0x146   : > { %605 = vmatprep.subr.bf16.mxu0 %v1750_v10  ;;  %646 = vmatprep.subr.bf16.mxu1 %v1791_v17 }
 0x149   : > { %606 = vmatpush1.bf16.msra.mxu0 %v1768_v13  ;;  %647 = vmatpush1.bf16.msra.mxu1 %v1809_v20 }
 0x14a   : > { %607 = vmatprep.subr.bf16.mxu0 %v1773_v14  ;;  %648 = vmatprep.subr.bf16.mxu1 %v1815_v21 }
 0x14d   : > { %608 = vmatpush1.bf16.msra.mxu0 %v1797_v18  ;;  %649 = vmatpush1.bf16.msra.mxu1 %v1833_v24 }
 0x14e   : > { %609 = vmatprep.subr.bf16.mxu0 %v1803_v19  ;;  %650 = vmatprep.subr.bf16.mxu1 %v1839_v25 }
 0x151   : > { %610 = vmatpush1.bf16.msra.mxu0 %v1820_v22  ;;  %651 = vmatpush1.bf16.msra.mxu1 %v1857_v28 }
 0x152   : > { %611 = vmatprep.subr.bf16.mxu0 %v1826_v23  ;;  %652 = vmatprep.subr.bf16.mxu1 %v1863_v29 }
 0x155   : > { %612 = vmatpush1.bf16.msra.mxu0 %v1845_v26  ;;  %653 = vmatpush1.bf16.msra.mxu1 %v1876_v32 }
 0x156   : > { %613 = vmatprep.subr.bf16.mxu0 %v1851_v27  ;;  %654 = vmatprep.subr.bf16.mxu1 %v1882_v33 }
 0x159   : > { %614 = vmatpush1.bf16.msra.mxu0 %v1869_v30  ;;  %655 = vmatpush1.bf16.msra.mxu1 %v1889_v35 }
 0x15a   : > { %720 = vmatprep.subr.bf16.mxu0 %v1702_v1  ;;  %761 = vmatprep.subr.bf16.mxu1 %v1732_v7 }
 0x20f   : > { %v512_v50 = vpop.f32.mrb[4].mxu0  ;;  %v553_v51 = vpop.f32.mrb[4].mxu1 }
 0x210   : > { %v560_v52 = vadd.f32 %v512_v50, %v471_v47  ;;  %v514_v53 = vpop.f32.mrb[5].mxu0  ;;  %v555_v54 = vpop.f32.mrb[5].mxu1  ;;  %v562_v38 = vadd.f32 %v553_v51, %v473_v36 }
 0x211   : > { %v561_v55 = vadd.f32 %v514_v53, %v472_v48  ;;  %v516_v57 = vpop.f32.mrb[6].mxu0  ;;  %v557_v58 = vpop.f32.mrb[6].mxu1  ;;  %v563_v31 = vadd.f32 %v555_v54, %v474_v56 }
 0x212   : > { %v564_v59 = vsub.f32 0.0, %v560_v52  ;;  %v517_v60 = vpop.f32.mrb[7].mxu0  ;;  %v558_v61 = vpop.f32.mrb[7].mxu1  ;;  %v1418_v58 = vld [vmem:[%s1692_s16 + $0x28] sm:$0xff] }
 0x213   : > { %v569_v62 = vsub.f32 0.0, %v561_v55  ;;  %v575_v34 = vsub.f32 0.0, %v563_v31  ;;  %v595_v31 = vunpack.c.h.bf16 %v1418_v58 }
 0x214   : > { %v565_v63 = vmul.f32 1.442695, %v564_v59 }
 0x215   : > { %v570_v0 = vmul.f32 1.442695, %v569_v62  ;;  %v576_v37 = vmul.f32 1.442695, %v575_v34 }
 0x216   : > { %1512 = vpow2.f32 %v565_v63 }
 0x217   : > { %1514 = vpow2.f32 %v570_v0 }
 0x218   : > { %1516 = vpow2.f32 %v576_v37 }
 0x219   : > { %1518 = vtanh.f32 %v562_v38 }
 0x220   : > { %v1513_v39 = vpop.eup %1512 }
 0x221   : > { %v1515_v41 = vpop.eup %1514  ;;  %v567_v42 = vadd.f32 1.0, %v1513_v39 }
 0x222   : > { %v572_v43 = vadd.f32 1.0, %v1515_v41  ;;  %v1517_v44 = vpop.eup %1516 }
 0x223   : > { %1520 = vrcp.f32 %v567_v42  ;;  %v1519_v45 = vpop.eup %1518  ;;  %v578_v50 = vadd.f32 1.0, %v1517_v44 }
 0x224   : > { %1522 = vrcp.f32 %v572_v43 }
 0x225   : > { %1524 = vrcp.f32 %v578_v50 }
 0x22d   : > { %v1521_v46 = vpop.eup %1520 }
 0x22e   : > { %v1523_v47 = vpop.eup %1522  ;;  %v581_v48 = vmul.f32 %v1521_v46, %v1519_v45  ;;  %v594_v46 = vunpack.c.l.bf16 %v1418_v58 }
 0x22f   : > { %v580_v52 = vmul.f32 %v1523_v47, %v1931_v40  ;;  %v1525_v51 = vpop.eup %1524  ;;  %v1417_v40 = vld [vmem:[%s1692_s16 + $0x20] sm:$0xff] }
 0x230   : > { %v592_v56 = vunpack.c.l.bf16 %v1417_v40  ;;  %v593_v57 = vunpack.c.h.bf16 %v1417_v40 }
 0x231   : > { %v1972_v49 = vadd.f32 %v581_v48, %v580_v52 }
 0x233   : > { %1526 = vtanh.f32 %v1972_v49 }
 0x23d   : > { %v1527_v53 = vpop.eup %1526 }
 0x23e   : > { %v584_v54 = vmul.f32 %v1527_v53, %v1525_v51 }
 0x240   : > { %1416 = vst [vmem:[%s1697_s19 + $0x8] sm:$0xff] %v584_v54  ;;  %v598_v55 = vpack.c.bf16 %v584_v54, %v584_v54 }
 0x242   : > { %632 = vmatmul.mubr.bf16.vlgmr.msra.gmra.mrb[8].mxu0 %v598_v55  ;;  %673 = vmatmul.mubr.bf16.vlgmr.msra.gmra.mrb[8].mxu1 %v598_v55 }
 0x243   : > { %721 = vmatpush1.bf16.msra.mxu0 %v1707_v2  ;;  %762 = vmatpush1.bf16.msra.mxu1 %v1737_v8 }
 0x244   : > { %722 = vmatprep.subr.bf16.mxu0 %v1715_v4  ;;  %763 = vmatprep.subr.bf16.mxu1 %v1756_v11 }
 0x245   : > { %752 = vmatprep.mubr.bf16.mxu0 %v1665_v3  ;;  %793 = vmatprep.mubr.bf16.mxu1 %v1665_v3 }
 0x247   : > { %723 = vmatpush1.bf16.msra.mxu0 %v1721_v5  ;;  %764 = vmatpush1.bf16.msra.mxu1 %v1761_v12 }
 0x248   : > { %724 = vmatprep.subr.bf16.mxu0 %v1727_v6  ;;  %765 = vmatprep.subr.bf16.mxu1 %v1778_v15 }
 0x24b   : > { %725 = vmatpush1.bf16.msra.mxu0 %v1743_v9  ;;  %766 = vmatpush1.bf16.msra.mxu1 %v1785_v16 }
 0x24c   : > { %726 = vmatprep.subr.bf16.mxu0 %v1750_v10  ;;  %767 = vmatprep.subr.bf16.mxu1 %v1791_v17 }
 0x24f   : > { %727 = vmatpush1.bf16.msra.mxu0 %v1768_v13  ;;  %768 = vmatpush1.bf16.msra.mxu1 %v1809_v20 }
 0x250   : > { %728 = vmatprep.subr.bf16.mxu0 %v1773_v14  ;;  %769 = vmatprep.subr.bf16.mxu1 %v1815_v21 }
 0x253   : > { %729 = vmatpush1.bf16.msra.mxu0 %v1797_v18  ;;  %770 = vmatpush1.bf16.msra.mxu1 %v1833_v24 }
 0x254   : > { %730 = vmatprep.subr.bf16.mxu0 %v1803_v19  ;;  %771 = vmatprep.subr.bf16.mxu1 %v1839_v25 }
 0x257   : > { %731 = vmatpush1.bf16.msra.mxu0 %v1820_v22  ;;  %772 = vmatpush1.bf16.msra.mxu1 %v1857_v28 }
 0x258   : > { %732 = vmatprep.subr.bf16.mxu0 %v1826_v23  ;;  %773 = vmatprep.subr.bf16.mxu1 %v1863_v29 }
 0x25b   : > { %733 = vmatpush1.bf16.msra.mxu0 %v1845_v26  ;;  %774 = vmatpush1.bf16.msra.mxu1 %v1876_v32 }
 0x25c   : > { %734 = vmatprep.subr.bf16.mxu0 %v1851_v27  ;;  %775 = vmatprep.subr.bf16.mxu1 %v1882_v33 }
 0x25f   : > { %735 = vmatpush1.bf16.msra.mxu0 %v1869_v30  ;;  %776 = vmatpush1.bf16.msra.mxu1 %v1889_v35 }
 0x260   : > { %841 = vmatprep.subr.bf16.mxu0 %v1702_v1  ;;  %882 = vmatprep.subr.bf16.mxu1 %v1732_v7 }
 0x315   : > { %v633_v59 = vpop.f32.mrb[8].mxu0  ;;  %v674_v60 = vpop.f32.mrb[8].mxu1 }
 0x316   : > { %v681_v61 = vadd.f32 %v633_v59, %v592_v56  ;;  %v635_v62 = vpop.f32.mrb[9].mxu0  ;;  %v676_v63 = vpop.f32.mrb[9].mxu1  ;;  %v683_v48 = vadd.f32 %v674_v60, %v594_v46 }
 0x317   : > { %v682_v0 = vadd.f32 %v635_v62, %v593_v57  ;;  %v637_v34 = vpop.f32.mrb[10].mxu0  ;;  %v678_v36 = vpop.f32.mrb[10].mxu1  ;;  %v684_v44 = vadd.f32 %v676_v63, %v595_v31 }
 0x318   : > { %v685_v37 = vsub.f32 0.0, %v681_v61  ;;  %v638_v38 = vpop.f32.mrb[11].mxu0  ;;  %v679_v39 = vpop.f32.mrb[11].mxu1  ;;  %v1421_v36 = vld [vmem:[%s1692_s16 + $0x38] sm:$0xff] }
 0x319   : > { %v690_v41 = vsub.f32 0.0, %v682_v0  ;;  %v696_v45 = vsub.f32 0.0, %v684_v44  ;;  %v716_v44 = vunpack.c.h.bf16 %v1421_v36 }
 0x31a   : > { %v686_v42 = vmul.f32 1.442695, %v685_v37 }
 0x31b   : > { %v691_v43 = vmul.f32 1.442695, %v690_v41  ;;  %v697_v47 = vmul.f32 1.442695, %v696_v45 }
 0x31c   : > { %1528 = vpow2.f32 %v686_v42 }
 0x31d   : > { %1530 = vpow2.f32 %v691_v43 }
 0x31e   : > { %1532 = vpow2.f32 %v697_v47 }
 0x31f   : > { %1534 = vtanh.f32 %v683_v48 }
 0x326   : > { %v1529_v50 = vpop.eup %1528 }
 0x327   : > { %v1531_v52 = vpop.eup %1530  ;;  %v688_v51 = vadd.f32 1.0, %v1529_v50 }
 0x328   : > { %v693_v53 = vadd.f32 1.0, %v1531_v52  ;;  %v1533_v54 = vpop.eup %1532 }
 0x329   : > { %1536 = vrcp.f32 %v688_v51  ;;  %v1535_v55 = vpop.eup %1534  ;;  %v699_v59 = vadd.f32 1.0, %v1533_v54 }
 0x32a   : > { %1538 = vrcp.f32 %v693_v53 }
 0x32b   : > { %1540 = vrcp.f32 %v699_v59 }
 0x333   : > { %v1537_v40 = vpop.eup %1536 }
 0x334   : > { %v1539_v56 = vpop.eup %1538  ;;  %v702_v57 = vmul.f32 %v1537_v40, %v1535_v55  ;;  %v715_v40 = vunpack.c.l.bf16 %v1421_v36 }
 0x335   : > { %v701_v61 = vmul.f32 %v1539_v56, %v1972_v49  ;;  %v1541_v60 = vpop.eup %1540  ;;  %v1420_v49 = vld [vmem:[%s1692_s16 + $0x30] sm:$0xff] }
 0x336   : > { %v713_v31 = vunpack.c.l.bf16 %v1420_v49  ;;  %v714_v34 = vunpack.c.h.bf16 %v1420_v49 }
 0x337   : > { %v2013_v58 = vadd.f32 %v702_v57, %v701_v61 }
 0x339   : > { %1542 = vtanh.f32 %v2013_v58 }
 0x343   : > { %v1543_v62 = vpop.eup %1542 }
 0x344   : > { %v705_v63 = vmul.f32 %v1543_v62, %v1541_v60 }
 0x346   : > { %1419 = vst [vmem:[%s1697_s19 + $0x10] sm:$0xff] %v705_v63  ;;  %v719_v0 = vpack.c.bf16 %v705_v63, %v705_v63 }
 0x348   : > { %753 = vmatmul.mubr.bf16.vlgmr.msra.gmra.mrb[12].mxu0 %v719_v0  ;;  %794 = vmatmul.mubr.bf16.vlgmr.msra.gmra.mrb[12].mxu1 %v719_v0 }
 0x349   : > { %842 = vmatpush1.bf16.msra.mxu0 %v1707_v2  ;;  %883 = vmatpush1.bf16.msra.mxu1 %v1737_v8 }
 0x34a   : > { %843 = vmatprep.subr.bf16.mxu0 %v1715_v4  ;;  %884 = vmatprep.subr.bf16.mxu1 %v1756_v11 }
 0x34b   : > { %873 = vmatprep.mubr.bf16.mxu0 %v1665_v3  ;;  %914 = vmatprep.mubr.bf16.mxu1 %v1665_v3 }
 0x34d   : > { %844 = vmatpush1.bf16.msra.mxu0 %v1721_v5  ;;  %885 = vmatpush1.bf16.msra.mxu1 %v1761_v12 }
 0x34e   : > { %845 = vmatprep.subr.bf16.mxu0 %v1727_v6  ;;  %886 = vmatprep.subr.bf16.mxu1 %v1778_v15 }
 0x351   : > { %846 = vmatpush1.bf16.msra.mxu0 %v1743_v9  ;;  %887 = vmatpush1.bf16.msra.mxu1 %v1785_v16 }
 0x352   : > { %847 = vmatprep.subr.bf16.mxu0 %v1750_v10  ;;  %888 = vmatprep.subr.bf16.mxu1 %v1791_v17 }
 0x355   : > { %848 = vmatpush1.bf16.msra.mxu0 %v1768_v13  ;;  %889 = vmatpush1.bf16.msra.mxu1 %v1809_v20 }
 0x356   : > { %849 = vmatprep.subr.bf16.mxu0 %v1773_v14  ;;  %890 = vmatprep.subr.bf16.mxu1 %v1815_v21 }
 0x359   : > { %850 = vmatpush1.bf16.msra.mxu0 %v1797_v18  ;;  %891 = vmatpush1.bf16.msra.mxu1 %v1833_v24 }
 0x35a   : > { %851 = vmatprep.subr.bf16.mxu0 %v1803_v19  ;;  %892 = vmatprep.subr.bf16.mxu1 %v1839_v25 }
 0x35d   : > { %852 = vmatpush1.bf16.msra.mxu0 %v1820_v22  ;;  %893 = vmatpush1.bf16.msra.mxu1 %v1857_v28 }
 0x35e   : > { %853 = vmatprep.subr.bf16.mxu0 %v1826_v23  ;;  %894 = vmatprep.subr.bf16.mxu1 %v1863_v29 }
 0x361   : > { %854 = vmatpush1.bf16.msra.mxu0 %v1845_v26  ;;  %895 = vmatpush1.bf16.msra.mxu1 %v1876_v32 }
 0x362   : > { %855 = vmatprep.subr.bf16.mxu0 %v1851_v27  ;;  %896 = vmatprep.subr.bf16.mxu1 %v1882_v33 }
 0x365   : > { %856 = vmatpush1.bf16.msra.mxu0 %v1869_v30  ;;  %897 = vmatpush1.bf16.msra.mxu1 %v1889_v35 }
 0x366   : > { %962 = vmatprep.subr.bf16.mxu0 %v1702_v1  ;;  %1003 = vmatprep.subr.bf16.mxu1 %v1732_v7 }
 0x41b   : > { %v754_v37 = vpop.f32.mrb[12].mxu0  ;;  %v795_v38 = vpop.f32.mrb[12].mxu1 }
 0x41c   : > { %v802_v39 = vadd.f32 %v754_v37, %v713_v31  ;;  %v756_v41 = vpop.f32.mrb[13].mxu0  ;;  %v797_v42 = vpop.f32.mrb[13].mxu1  ;;  %v804_v57 = vadd.f32 %v795_v38, %v715_v40 }
 0x41d   : > { %v803_v43 = vadd.f32 %v756_v41, %v714_v34  ;;  %v758_v45 = vpop.f32.mrb[14].mxu0  ;;  %v799_v46 = vpop.f32.mrb[14].mxu1  ;;  %v805_v54 = vadd.f32 %v797_v42, %v716_v44 }
 0x41e   : > { %v806_v47 = vsub.f32 0.0, %v802_v39  ;;  %v759_v48 = vpop.f32.mrb[15].mxu0  ;;  %v800_v50 = vpop.f32.mrb[15].mxu1 }
 0x41f   : > { %v811_v52 = vsub.f32 0.0, %v803_v43  ;;  %v817_v55 = vsub.f32 0.0, %v805_v54 }
 0x420   : > { %v807_v51 = vmul.f32 1.442695, %v806_v47 }
 0x421   : > { %v812_v53 = vmul.f32 1.442695, %v811_v52  ;;  %v818_v56 = vmul.f32 1.442695, %v817_v55 }
 0x422   : > { %1544 = vpow2.f32 %v807_v51 }
 0x423   : > { %1546 = vpow2.f32 %v812_v53 }
 0x424   : > { %1548 = vpow2.f32 %v818_v56 }
 0x425   : > { %1550 = vtanh.f32 %v804_v57 }
 0x42c   : > { %v1545_v59 = vpop.eup %1544 }
 0x42d   : > { %v1547_v61 = vpop.eup %1546  ;;  %v809_v60 = vadd.f32 1.0, %v1545_v59 }
 0x42e   : > { %v814_v62 = vadd.f32 1.0, %v1547_v61  ;;  %v1549_v63 = vpop.eup %1548 }
 0x42f   : > { %1552 = vrcp.f32 %v809_v60  ;;  %v1551_v0 = vpop.eup %1550  ;;  %v820_v37 = vadd.f32 1.0, %v1549_v63 }
 0x430   : > { %1554 = vrcp.f32 %v814_v62 }
 0x431   : > { %1556 = vrcp.f32 %v820_v37 }
 0x439   : > { %v1553_v49 = vpop.eup %1552 }
 0x43a   : > { %v1555_v31 = vpop.eup %1554  ;;  %v823_v34 = vmul.f32 %v1553_v49, %v1551_v0 }
 0x43b   : > { %v822_v39 = vmul.f32 %v1555_v31, %v2013_v58  ;;  %v1557_v38 = vpop.eup %1556 }
 0x43d   : > { %v2054_v36 = vadd.f32 %v823_v34, %v822_v39 }
 0x43f   : > { %1558 = vtanh.f32 %v2054_v36 }
 0x449   : > { %v1559_v41 = vpop.eup %1558 }
 0x44a   : > { %v826_v42 = vmul.f32 %v1559_v41, %v1557_v38 }
 0x44c   : > { %1422 = vst [vmem:[%s1697_s19 + $0x18] sm:$0xff] %v826_v42  ;;  %v840_v43 = vpack.c.bf16 %v826_v42, %v826_v42 }
 0x44e   : > { %874 = vmatmul.mubr.bf16.vlgmr.msra.gmra.mrb[16].mxu0 %v840_v43  ;;  %915 = vmatmul.mubr.bf16.vlgmr.msra.gmra.mrb[16].mxu1 %v840_v43 }
 0x44f   : > { %963 = vmatpush1.bf16.msra.mxu0 %v1707_v2  ;;  %1004 = vmatpush1.bf16.msra.mxu1 %v1737_v8  ;;  %v1423_v2 = vld [vmem:[%s1692_s16 + $0x40] sm:$0xff] }
 0x450   : > { %964 = vmatprep.subr.bf16.mxu0 %v1715_v4  ;;  %1005 = vmatprep.subr.bf16.mxu1 %v1756_v11  ;;  %v834_v4 = vunpack.c.l.bf16 %v1423_v2 }
 0x451   : > { %994 = vmatprep.mubr.bf16.mxu0 %v1665_v3  ;;  %1035 = vmatprep.mubr.bf16.mxu1 %v1665_v3 }
 0x453   : > { %965 = vmatpush1.bf16.msra.mxu0 %v1721_v5  ;;  %1006 = vmatpush1.bf16.msra.mxu1 %v1761_v12  ;;  %v835_v5 = vunpack.c.h.bf16 %v1423_v2 }
 0x454   : > { %966 = vmatprep.subr.bf16.mxu0 %v1727_v6  ;;  %1007 = vmatprep.subr.bf16.mxu1 %v1778_v15  ;;  %v1424_v6 = vld [vmem:[%s1692_s16 + $0x48] sm:$0xff] }
 0x455   : > { %v837_v47 = vunpack.c.h.bf16 %v1424_v6  ;;  %v836_v56 = vunpack.c.l.bf16 %v1424_v6  ;;  %v2118_v6 = vld [vmem:[%s2265_s1 + $0x20] ss:$16 sps:$4 sm:$0xff]  }
 0x457   : > { %967 = vmatpush1.bf16.msra.mxu0 %v1743_v9  ;;  %1008 = vmatpush1.bf16.msra.mxu1 %v1785_v16 }
 0x458   : > { %968 = vmatprep.subr.bf16.mxu0 %v1750_v10  ;;  %1009 = vmatprep.subr.bf16.mxu1 %v1791_v17 }
 0x45b   : > { %969 = vmatpush1.bf16.msra.mxu0 %v1768_v13  ;;  %1010 = vmatpush1.bf16.msra.mxu1 %v1809_v20 }
 0x45c   : > { %970 = vmatprep.subr.bf16.mxu0 %v1773_v14  ;;  %1011 = vmatprep.subr.bf16.mxu1 %v1815_v21 }
 0x45f   : > { %971 = vmatpush1.bf16.msra.mxu0 %v1797_v18  ;;  %1012 = vmatpush1.bf16.msra.mxu1 %v1833_v24 }
 0x460   : > { %972 = vmatprep.subr.bf16.mxu0 %v1803_v19  ;;  %1013 = vmatprep.subr.bf16.mxu1 %v1839_v25 }
 0x463   : > { %973 = vmatpush1.bf16.msra.mxu0 %v1820_v22  ;;  %1014 = vmatpush1.bf16.msra.mxu1 %v1857_v28 }
 0x464   : > { %974 = vmatprep.subr.bf16.mxu0 %v1826_v23  ;;  %1015 = vmatprep.subr.bf16.mxu1 %v1863_v29 }
 0x467   : > { %975 = vmatpush1.bf16.msra.mxu0 %v1845_v26  ;;  %1016 = vmatpush1.bf16.msra.mxu1 %v1876_v32 }
 0x468   : > { %976 = vmatprep.subr.bf16.mxu0 %v1851_v27  ;;  %1017 = vmatprep.subr.bf16.mxu1 %v1882_v33 }
 0x46b   : > { %977 = vmatpush1.bf16.msra.mxu0 %v1869_v30  ;;  %1018 = vmatpush1.bf16.msra.mxu1 %v1889_v35 }
 0x46c   : > { %1083 = vmatprep.subr.bf16.mxu0 %v1702_v1  ;;  %1124 = vmatprep.subr.bf16.mxu1 %v1732_v7 }
 0x521   : > { %v875_v9 = vpop.f32.mrb[16].mxu0  ;;  %v916_v10 = vpop.f32.mrb[16].mxu1 }
 0x522   : > { %v923_v58 = vadd.f32 %v875_v9, %v834_v4  ;;  %v877_v44 = vpop.f32.mrb[17].mxu0  ;;  %v918_v45 = vpop.f32.mrb[17].mxu1  ;;  %v925_v59 = vadd.f32 %v916_v10, %v836_v56 }
 0x523   : > { %v924_v46 = vadd.f32 %v877_v44, %v835_v5  ;;  %v879_v48 = vpop.f32.mrb[18].mxu0  ;;  %v920_v50 = vpop.f32.mrb[18].mxu1  ;;  %v926_v7 = vadd.f32 %v918_v45, %v837_v47  ;;  %v2102_v5 = vld [vmem:[%s2265_s1] ss:$16 sps:$4 sm:$0xff]  }
 0x524   : > { %v927_v52 = vsub.f32 0.0, %v923_v58  ;;  %v880_v51 = vpop.f32.mrb[19].mxu0  ;;  %v921_v53 = vpop.f32.mrb[19].mxu1 }
 0x525   : > { %v932_v54 = vsub.f32 0.0, %v924_v46  ;;  %v938_v40 = vsub.f32 0.0, %v926_v7 }
 0x526   : > { %v928_v1 = vmul.f32 1.442695, %v927_v52 }
 0x527   : > { %v933_v55 = vmul.f32 1.442695, %v932_v54  ;;  %v939_v57 = vmul.f32 1.442695, %v938_v40 }
 0x528   : > { %1560 = vpow2.f32 %v928_v1 }
 0x529   : > { %1562 = vpow2.f32 %v933_v55 }
 0x52a   : > { %1564 = vpow2.f32 %v939_v57 }
 0x52b   : > { %1566 = vtanh.f32 %v925_v59 }
 0x532   : > { %v1561_v61 = vpop.eup %1560 }
 0x533   : > { %v1563_v60 = vpop.eup %1562  ;;  %v930_v62 = vadd.f32 1.0, %v1561_v61 }
 0x534   : > { %v935_v63 = vadd.f32 1.0, %v1563_v60  ;;  %v1565_v0 = vpop.eup %1564  ;;  %v1632_v60 = vld [vmem:[%s2265_s1 + $0x8] ss:$16 sps:$4 sm:$0xff]  }
 0x535   : > { %1568 = vrcp.f32 %v930_v62  ;;  %v1567_v49 = vpop.eup %1566  ;;  %v941_v39 = vadd.f32 1.0, %v1565_v0  ;;  %v1633_v62 = vld [vmem:[%s2265_s1 + $0x2c] ss:$16 sps:$4 sm:$0xff]  }
 0x536   : > { %1570 = vrcp.f32 %v935_v63  ;;  %v1634_v63 = vld [vmem:[%s2265_s1 + $0x28] ss:$16 sps:$4 sm:$0xff]   ;;  %v1635_v0 = vld [vmem:[%s2265_s1 + $0x4c] ss:$16 sps:$4 sm:$0xff]  }
 0x537   : > { %1572 = vrcp.f32 %v941_v39  ;;  %v1641_v39 = vld [vmem:[%s2265_s1 + $0x8c] ss:$16 sps:$4 sm:$0xff]  }
 0x53f   : > { %v1569_v31 = vpop.eup %1568 }
 0x540   : > { %v1571_v34 = vpop.eup %1570  ;;  %v944_v37 = vmul.f32 %v1569_v31, %v1567_v49  ;;  %v1637_v49 = vld [vmem:[%s2265_s1 + $0x6c] ss:$16 sps:$4 sm:$0xff]   ;;  %v1638_v31 = vld [vmem:[%s2265_s1 + $0x60] ss:$16 sps:$4 sm:$0xff]  }
 0x541   : > { %v943_v38 = vmul.f32 %v1571_v34, %v2054_v36  ;;  %v1573_v42 = vpop.eup %1572  ;;  %v2109_v36 = vld [vmem:[%s2265_s1 + $0x24] ss:$16 sps:$4 sm:$0xff]   ;;  %v1639_v34 = vld [vmem:[%s2265_s1 + $0x68] ss:$16 sps:$4 sm:$0xff]  }
 0x543   : > { %v2095_v41 = vadd.f32 %v944_v37, %v943_v38  ;;  %v1640_v37 = vld [vmem:[%s2265_s1 + $0x84] ss:$16 sps:$4 sm:$0xff]   ;;  %v1642_v38 = vld [vmem:[%s2265_s1 + $0x80] ss:$16 sps:$4 sm:$0xff]  }
 0x545   : > { %1574 = vtanh.f32 %v2095_v41 }
 0x54f   : > { %v1575_v43 = vpop.eup %1574 }
 0x550   : > { %v947_v2 = vmul.f32 %v1575_v43, %v1573_v42  ;;  %v1644_v42 = vld [vmem:[%s2265_s1 + $0xa4] ss:$16 sps:$4 sm:$0xff]   ;;  %v1645_v43 = vld [vmem:[%s2265_s1 + $0xac] ss:$16 sps:$4 sm:$0xff]  }
 0x552   : > { %1425 = vst [vmem:[%s1697_s19 + $0x20] sm:$0xff] %v947_v2  ;;  %v961_v4 = vpack.c.bf16 %v947_v2, %v947_v2  ;;  %v1646_v2 = vld [vmem:[%s2265_s1 + $0xa0] ss:$16 sps:$4 sm:$0xff]  }
 0x554   : > { %995 = vmatmul.mubr.bf16.vlgmr.msra.gmra.mrb[20].mxu0 %v961_v4  ;;  %1036 = vmatmul.mubr.bf16.vlgmr.msra.gmra.mrb[20].mxu1 %v961_v4  ;;  %v1647_v4 = vld [vmem:[%s2265_s1 + $0xa8] ss:$16 sps:$4 sm:$0xff]  }
 0x555   : > { %1084 = vmatpush1.bf16.msra.mxu0 %v2102_v5  ;;  %1125 = vmatpush1.bf16.msra.mxu1 %v1737_v8  ;;  %v2125_v8 = vld [vmem:[%s2265_s1 + $0x44] ss:$16 sps:$4 sm:$0xff]  }
 0x556   : > { %1085 = vmatprep.subr.bf16.mxu0 %v2109_v36  ;;  %1126 = vmatprep.subr.bf16.mxu1 %v1756_v11  ;;  %v2132_v11 = vld [vmem:[%s2265_s1 + $0x40] ss:$16 sps:$4 sm:$0xff]  }
 0x557   : > { %1115 = vmatprep.mubr.bf16.mxu0 %v1665_v3  ;;  %1156 = vmatprep.mubr.bf16.mxu1 %v1665_v3 }
 0x559   : > { %1086 = vmatpush1.bf16.msra.mxu0 %v2118_v6  ;;  %1127 = vmatpush1.bf16.msra.mxu1 %v1761_v12  ;;  %v2139_v12 = vld [vmem:[%s2265_s1 + $0x64] ss:$16 sps:$4 sm:$0xff]  }
 0x55a   : > { %1087 = vmatprep.subr.bf16.mxu0 %v2125_v8  ;;  %1128 = vmatprep.subr.bf16.mxu1 %v1778_v15  ;;  %v1426_v15 = vld [vmem:[%s1692_s16 + $0x50] sm:$0xff] }
 0x55d   : > { %1088 = vmatpush1.bf16.msra.mxu0 %v2132_v11  ;;  %1129 = vmatpush1.bf16.msra.mxu1 %v1785_v16  ;;  %v955_v16 = vunpack.c.l.bf16 %v1426_v15 }
 0x55e   : > { %1089 = vmatprep.subr.bf16.mxu0 %v2139_v12  ;;  %1130 = vmatprep.subr.bf16.mxu1 %v1791_v17  ;;  %v956_v17 = vunpack.c.h.bf16 %v1426_v15  ;;  %v1429_v15 = vld [vmem:[%s1692_s16 + $0x60] sm:$0xff] }
 0x561   : > { %1090 = vmatpush1.bf16.msra.mxu0 %v1768_v13  ;;  %1131 = vmatpush1.bf16.msra.mxu1 %v1809_v20  ;;  %v1630_v13 = vld [vmem:[%s2265_s1 + $0x4] ss:$16 sps:$4 sm:$0xff]  }
 0x562   : > { %1091 = vmatprep.subr.bf16.mxu0 %v1773_v14  ;;  %1132 = vmatprep.subr.bf16.mxu1 %v1815_v21  ;;  %v1631_v14 = vld [vmem:[%s2265_s1 + $0xc] ss:$16 sps:$4 sm:$0xff]  }
 0x565   : > { %1092 = vmatpush1.bf16.msra.mxu0 %v1797_v18  ;;  %1133 = vmatpush1.bf16.msra.mxu1 %v1833_v24  ;;  %v1427_v18 = vld [vmem:[%s1692_s16 + $0x58] sm:$0xff] }
 0x566   : > { %1093 = vmatprep.subr.bf16.mxu0 %v1803_v19  ;;  %1134 = vmatprep.subr.bf16.mxu1 %v1839_v25  ;;  %v958_v25 = vunpack.c.h.bf16 %v1427_v18  ;;  %v957_v58 = vunpack.c.l.bf16 %v1427_v18  ;;  %v1430_v18 = vld [vmem:[%s1692_s16 + $0x68] sm:$0xff] }
 0x569   : > { %1094 = vmatpush1.bf16.msra.mxu0 %v1820_v22  ;;  %1135 = vmatpush1.bf16.msra.mxu1 %v1857_v28 }
 0x56a   : > { %1095 = vmatprep.subr.bf16.mxu0 %v1826_v23  ;;  %1136 = vmatprep.subr.bf16.mxu1 %v1863_v29 }
 0x56d   : > { %1096 = vmatpush1.bf16.msra.mxu0 %v1845_v26  ;;  %1137 = vmatpush1.bf16.msra.mxu1 %v1876_v32 }
 0x56e   : > { %1097 = vmatprep.subr.bf16.mxu0 %v1851_v27  ;;  %1138 = vmatprep.subr.bf16.mxu1 %v1882_v33 }
 0x571   : > { %1098 = vmatpush1.bf16.msra.mxu0 %v1869_v30  ;;  %1139 = vmatpush1.bf16.msra.mxu1 %v1889_v35 }
 0x572   : > { %1204 = vmatprep.subr.bf16.mxu0 %v1630_v13  ;;  %1245 = vmatprep.subr.bf16.mxu1 %v1631_v14  ;;  %v1654_v13 = vld [vmem:[%s2265_s1 + $0xe0] ss:$16 sps:$4 sm:$0xff]   ;;  %v1655_v14 = vld [vmem:[%s2265_s1 + $0xe8] ss:$16 sps:$4 sm:$0xff]  }
 0x627   : > { %v996_v19 = vpop.f32.mrb[20].mxu0  ;;  %v1037_v20 = vpop.f32.mrb[20].mxu1 }
 0x628   : > { %v1044_v21 = vadd.f32 %v996_v19, %v955_v16  ;;  %v998_v22 = vpop.f32.mrb[21].mxu0  ;;  %v1039_v23 = vpop.f32.mrb[21].mxu1  ;;  %v1046_v45 = vadd.f32 %v1037_v20, %v957_v58  ;;  %v1076_v16 = vunpack.c.l.bf16 %v1429_v15  ;;  %v1078_v58 = vunpack.c.l.bf16 %v1430_v18 }
 0x629   : > { %v1045_v24 = vadd.f32 %v998_v22, %v956_v17  ;;  %v1000_v26 = vpop.f32.mrb[22].mxu0  ;;  %v1041_v27 = vpop.f32.mrb[22].mxu1  ;;  %v1047_v9 = vadd.f32 %v1039_v23, %v958_v25  ;;  %v1077_v17 = vunpack.c.h.bf16 %v1429_v15  ;;  %v1079_v25 = vunpack.c.h.bf16 %v1430_v18 }
 0x62a   : > { %v1048_v28 = vsub.f32 0.0, %v1044_v21  ;;  %v1001_v29 = vpop.f32.mrb[23].mxu0  ;;  %v1042_v30 = vpop.f32.mrb[23].mxu1 }
 0x62b   : > { %v1053_v32 = vsub.f32 0.0, %v1045_v24  ;;  %v1059_v10 = vsub.f32 0.0, %v1047_v9 }
 0x62c   : > { %v1049_v33 = vmul.f32 1.442695, %v1048_v28 }
 0x62d   : > { %v1054_v35 = vmul.f32 1.442695, %v1053_v32  ;;  %v1060_v44 = vmul.f32 1.442695, %v1059_v10 }
 0x62e   : > { %1576 = vpow2.f32 %v1049_v33 }
 0x62f   : > { %1578 = vpow2.f32 %v1054_v35 }
 0x630   : > { %1580 = vpow2.f32 %v1060_v44 }
 0x631   : > { %1582 = vtanh.f32 %v1046_v45 }
 0x638   : > { %v1577_v46 = vpop.eup %1576 }
 0x639   : > { %v1579_v47 = vpop.eup %1578  ;;  %v1051_v48 = vadd.f32 1.0, %v1577_v46 }
 0x63a   : > { %v1056_v50 = vadd.f32 1.0, %v1579_v47  ;;  %v1581_v52 = vpop.eup %1580 }
 0x63b   : > { %1584 = vrcp.f32 %v1051_v48  ;;  %v1583_v51 = vpop.eup %1582  ;;  %v1062_v55 = vadd.f32 1.0, %v1581_v52 }
 0x63c   : > { %1586 = vrcp.f32 %v1056_v50 }
 0x63d   : > { %1588 = vrcp.f32 %v1062_v55 }
 0x645   : > { %v1585_v53 = vpop.eup %1584 }
 0x646   : > { %v1587_v54 = vpop.eup %1586  ;;  %v1065_v1 = vmul.f32 %v1585_v53, %v1583_v51 }
 0x647   : > { %v1064_v7 = vmul.f32 %v1587_v54, %v2095_v41  ;;  %v1589_v56 = vpop.eup %1588  ;;  %v1643_v41 = vld [vmem:[%s2265_s1 + $0x88] ss:$16 sps:$4 sm:$0xff]  }
 0x649   : > { %v2170_v40 = vadd.f32 %v1065_v1, %v1064_v7 }
 0x64b   : > { %1590 = vtanh.f32 %v2170_v40 }
 0x655   : > { %v1591_v57 = vpop.eup %1590 }
 0x656   : > { %v1068_v59 = vmul.f32 %v1591_v57, %v1589_v56 }
 0x658   : > { %1428 = vst [vmem:[%s1697_s19 + $0x28] sm:$0xff] %v1068_v59  ;;  %v1082_v61 = vpack.c.bf16 %v1068_v59, %v1068_v59 }
 0x65a   : > { %1116 = vmatmul.mubr.bf16.vlgmr.msra.gmra.mrb[24].mxu0 %v1082_v61  ;;  %1157 = vmatmul.mubr.bf16.vlgmr.msra.gmra.mrb[24].mxu1 %v1082_v61 }
 0x65b   : > { %1205 = vmatpush1.bf16.msra.mxu0 %v2102_v5  ;;  %1246 = vmatpush1.bf16.msra.mxu1 %v1632_v60  ;;  %v1648_v5 = vld [vmem:[%s2265_s1 + $0xc4] ss:$16 sps:$4 sm:$0xff]  }
 0x65c   : > { %1206 = vmatprep.subr.bf16.mxu0 %v2109_v36  ;;  %1247 = vmatprep.subr.bf16.mxu1 %v1633_v62  ;;  %v1649_v36 = vld [vmem:[%s2265_s1 + $0xcc] ss:$16 sps:$4 sm:$0xff]   ;;  %v1432_v62 = vld [vmem:[%s1692_s16 + $0x70] sm:$0xff] }
 0x65d   : > { %1236 = vmatprep.mubr.bf16.mxu0 %v1665_v3  ;;  %1277 = vmatprep.mubr.bf16.mxu1 %v1665_v3  ;;  %v1636_v3 = vld [vmem:[%s2265_s1 + $0x48] ss:$16 sps:$4 sm:$0xff]  }
 0x65f   : > { %1207 = vmatpush1.bf16.msra.mxu0 %v2118_v6  ;;  %1248 = vmatpush1.bf16.msra.mxu1 %v1634_v63  ;;  %v1650_v6 = vld [vmem:[%s2265_s1 + $0xc0] ss:$16 sps:$4 sm:$0xff]   ;;  %v1197_v63 = vunpack.c.l.bf16 %v1432_v62 }
 0x660   : > { %1208 = vmatprep.subr.bf16.mxu0 %v2125_v8  ;;  %1249 = vmatprep.subr.bf16.mxu1 %v1635_v0  ;;  %v1651_v8 = vld [vmem:[%s2265_s1 + $0xc8] ss:$16 sps:$4 sm:$0xff]   ;;  %v1198_v0 = vunpack.c.h.bf16 %v1432_v62 }
 0x663   : > { %1209 = vmatpush1.bf16.msra.mxu0 %v2132_v11  ;;  %1250 = vmatpush1.bf16.msra.mxu1 %v1636_v3  ;;  %v1652_v11 = vld [vmem:[%s2265_s1 + $0xe4] ss:$16 sps:$4 sm:$0xff]   ;;  %v1433_v3 = vld [vmem:[%s1692_s16 + $0x78] sm:$0xff] }
 0x664   : > { %1210 = vmatprep.subr.bf16.mxu0 %v2139_v12  ;;  %1251 = vmatprep.subr.bf16.mxu1 %v1637_v49  ;;  %v1653_v12 = vld [vmem:[%s2265_s1 + $0xec] ss:$16 sps:$4 sm:$0xff]  }
 0x667   : > { %1211 = vmatpush1.bf16.msra.mxu0 %v1638_v31  ;;  %1252 = vmatpush1.bf16.msra.mxu1 %v1639_v34 }
 0x668   : > { %1212 = vmatprep.subr.bf16.mxu0 %v1640_v37  ;;  %1253 = vmatprep.subr.bf16.mxu1 %v1641_v39 }
 0x66b   : > { %1213 = vmatpush1.bf16.msra.mxu0 %v1642_v38  ;;  %1254 = vmatpush1.bf16.msra.mxu1 %v1643_v41  ;;  %v1200_v38 = vunpack.c.h.bf16 %v1433_v3 }
 0x66c   : > { %1214 = vmatprep.subr.bf16.mxu0 %v1644_v42  ;;  %1255 = vmatprep.subr.bf16.mxu1 %v1645_v43 }
 0x66f   : > { %1215 = vmatpush1.bf16.msra.mxu0 %v1646_v2  ;;  %1256 = vmatpush1.bf16.msra.mxu1 %v1647_v4 }
 0x670   : > { %1216 = vmatprep.subr.bf16.mxu0 %v1648_v5  ;;  %1257 = vmatprep.subr.bf16.mxu1 %v1649_v36 }
 0x673   : > { %1217 = vmatpush1.bf16.msra.mxu0 %v1650_v6  ;;  %1258 = vmatpush1.bf16.msra.mxu1 %v1651_v8 }
 0x674   : > { %1218 = vmatprep.subr.bf16.mxu0 %v1652_v11  ;;  %1259 = vmatprep.subr.bf16.mxu1 %v1653_v12  ;;  %v1199_v12 = vunpack.c.l.bf16 %v1433_v3 }
 0x677   : > { %1219 = vmatpush1.bf16.msra.mxu0 %v1654_v13  ;;  %1260 = vmatpush1.bf16.msra.mxu1 %v1655_v14 }
 0x72d   : > { %v1117_v19 = vpop.f32.mrb[24].mxu0  ;;  %v1158_v20 = vpop.f32.mrb[24].mxu1 }
 0x72e   : > { %v1165_v21 = vadd.f32 %v1117_v19, %v1076_v16  ;;  %v1119_v22 = vpop.f32.mrb[25].mxu0  ;;  %v1160_v23 = vpop.f32.mrb[25].mxu1  ;;  %v1167_v45 = vadd.f32 %v1158_v20, %v1078_v58 }
 0x72f   : > { %v1166_v24 = vadd.f32 %v1119_v22, %v1077_v17  ;;  %v1121_v26 = vpop.f32.mrb[26].mxu0  ;;  %v1162_v27 = vpop.f32.mrb[26].mxu1  ;;  %v1168_v9 = vadd.f32 %v1160_v23, %v1079_v25 }
 0x730   : > { %v1169_v28 = vsub.f32 0.0, %v1165_v21  ;;  %v1122_v29 = vpop.f32.mrb[27].mxu0  ;;  %v1163_v30 = vpop.f32.mrb[27].mxu1 }
 0x731   : > { %v1174_v32 = vsub.f32 0.0, %v1166_v24  ;;  %v1180_v10 = vsub.f32 0.0, %v1168_v9 }
 0x732   : > { %v1170_v33 = vmul.f32 1.442695, %v1169_v28 }
 0x733   : > { %v1175_v35 = vmul.f32 1.442695, %v1174_v32  ;;  %v1181_v44 = vmul.f32 1.442695, %v1180_v10 }
 0x734   : > { %1592 = vpow2.f32 %v1170_v33 }
 0x735   : > { %1594 = vpow2.f32 %v1175_v35 }
 0x736   : > { %1596 = vpow2.f32 %v1181_v44 }
 0x737   : > { %1598 = vtanh.f32 %v1167_v45 }
 0x73e   : > { %v1593_v46 = vpop.eup %1592 }
 0x73f   : > { %v1595_v47 = vpop.eup %1594  ;;  %v1172_v48 = vadd.f32 1.0, %v1593_v46 }
 0x740   : > { %v1177_v50 = vadd.f32 1.0, %v1595_v47  ;;  %v1597_v52 = vpop.eup %1596 }
 0x741   : > { %1600 = vrcp.f32 %v1172_v48  ;;  %v1599_v51 = vpop.eup %1598  ;;  %v1183_v55 = vadd.f32 1.0, %v1597_v52 }
 0x742   : > { %1602 = vrcp.f32 %v1177_v50 }
 0x743   : > { %1604 = vrcp.f32 %v1183_v55 }
 0x74b   : > { %v1601_v53 = vpop.eup %1600 }
 0x74c   : > { %v1603_v54 = vpop.eup %1602  ;;  %v1186_v1 = vmul.f32 %v1601_v53, %v1599_v51 }
 0x74d   : > { %v1185_v7 = vmul.f32 %v1603_v54, %v2170_v40  ;;  %v1605_v57 = vpop.eup %1604 }
 0x74f   : > { %v1187_v56 = vadd.f32 %v1186_v1, %v1185_v7 }
 0x751   : > { %1606 = vtanh.f32 %v1187_v56 }
 0x75b   : > { %v1607_v59 = vpop.eup %1606 }
 0x75c   : > { %v1189_v61 = vmul.f32 %v1607_v59, %v1605_v57 }
 0x75e   : > { %1431 = vst [vmem:[%s1697_s19 + $0x30] sm:$0xff] %v1189_v61  ;;  %v1203_v60 = vpack.c.bf16 %v1189_v61, %v1189_v61 }
 0x760   : > { %1237 = vmatmul.mubr.bf16.vlgmr.msra.gmra.mrb[28].mxu0 %v1203_v60  ;;  %1278 = vmatmul.mubr.bf16.vlgmr.msra.gmra.mrb[28].mxu1 %v1203_v60 }
 0x833   : > { %v1238_v49 = vpop.f32.mrb[28].mxu0  ;;  %v1279_v31 = vpop.f32.mrb[28].mxu1 }
 0x834   : > { %v1286_v34 = vadd.f32 %v1238_v49, %v1197_v63  ;;  %v1240_v37 = vpop.f32.mrb[29].mxu0  ;;  %v1281_v39 = vpop.f32.mrb[29].mxu1  ;;  %v1288_v14 = vadd.f32 %v1279_v31, %v1199_v12 }
 0x835   : > { %v1287_v40 = vadd.f32 %v1240_v37, %v1198_v0  ;;  %v1242_v41 = vpop.f32.mrb[30].mxu0  ;;  %v1283_v42 = vpop.f32.mrb[30].mxu1  ;;  %v1289_v8 = vadd.f32 %v1281_v39, %v1200_v38 }
 0x836   : > { %v1290_v43 = vsub.f32 0.0, %v1286_v34  ;;  %v1243_v2 = vpop.f32.mrb[31].mxu0  ;;  %v1284_v4 = vpop.f32.mrb[31].mxu1 }
 0x837   : > { %v1295_v5 = vsub.f32 0.0, %v1287_v40  ;;  %v1301_v11 = vsub.f32 0.0, %v1289_v8 }
 0x838   : > { %v1291_v36 = vmul.f32 1.442695, %v1290_v43 }
 0x839   : > { %v1296_v6 = vmul.f32 1.442695, %v1295_v5  ;;  %v1302_v13 = vmul.f32 1.442695, %v1301_v11 }
 0x83a   : > { %1608 = vpow2.f32 %v1291_v36 }
 0x83b   : > { %1610 = vpow2.f32 %v1296_v6 }
 0x83c   : > { %1612 = vpow2.f32 %v1302_v13 }
 0x83d   : > { %1614 = vtanh.f32 %v1288_v14 }
 0x844   : > { %v1609_v15 = vpop.eup %1608 }
 0x845   : > { %v1611_v16 = vpop.eup %1610  ;;  %v1293_v17 = vadd.f32 1.0, %v1609_v15 }
 0x846   : > { %v1298_v18 = vadd.f32 1.0, %v1611_v16  ;;  %v1613_v19 = vpop.eup %1612 }
 0x847   : > { %1616 = vrcp.f32 %v1293_v17  ;;  %v1615_v20 = vpop.eup %1614  ;;  %v1304_v24 = vadd.f32 1.0, %v1613_v19 }
 0x848   : > { %1618 = vrcp.f32 %v1298_v18 }
 0x849   : > { %1620 = vrcp.f32 %v1304_v24 }
 0x851   : > { %v1617_v21 = vpop.eup %1616 }
 0x852   : > { %v1619_v22 = vpop.eup %1618  ;;  %v1307_v23 = vmul.f32 %v1617_v21, %v1615_v20 }
 0x853   : > { %v1306_v25 = vmul.f32 %v1619_v22, %v1187_v56  ;;  %v1621_v27 = vpop.eup %1620 }
 0x855   : > { %v1308_v26 = vadd.f32 %v1307_v23, %v1306_v25 }
 0x857   : > { %1622 = vtanh.f32 %v1308_v26  ;;  %1311 = vst [vmem:[#allocation3] sm:$0xff] %v1308_v26 }
 0x861   : > { %v1623_v28 = vpop.eup %1622 }
 0x862   : > { %v1310_v29 = vmul.f32 %v1623_v28, %v1621_v27 }
 0x864   : > { %1312 = vst [vmem:[#allocation2] sm:$0xff] %v1310_v29  ;;  %1434 = vst [vmem:[%s1697_s19 + $0x38] sm:$0xff] %v1310_v29 }
 0x865 PF: > { %s12_s9 = sadd.s32 1, %s1662_s9  }
 0x866   : > { %p9_p5 = scmp.ge.s32.totalorder %s12_s9, 4  }
 0x868   :  { %11 = sbr.rel (!%p9_p5) target bundleno = 1 (0x1), region = 76 }

</bundles_post_ra>
